<compile_context>
chip_gen: v7x
topology: tpu7x:2x2x1
jax: 0.10.0
libtpu: 0.0.40
codegen_flags: <defaults>
</compile_context>

<pallas_src>
import functools

import jax
import jax.numpy as jnp
from jax.experimental import pallas as pl
from jax.experimental.pallas import tpu as pltpu

_LANE = 128


def _round_up(x, m):
    return ((x + m - 1) // m) * m


def _encoder_kernel(x1_ref, x2_ref,
                    w1a_ref, w1b_ref, b1_ref,
                    w2_ref, b2_ref,
                    w3_ref, b3_ref,
                    w4_ref, b4_ref,
                    o_ref):
    compute_dtype = w2_ref.dtype
    # Layer 1: concat([x1, x2]) @ W1 + b1, as two MXU matmuls (concat folded).
    h = (jnp.dot(x1_ref[...], w1a_ref[...], preferred_element_type=jnp.float32)
         + jnp.dot(x2_ref[...], w1b_ref[...], preferred_element_type=jnp.float32)
         + b1_ref[...])
    h = jnp.maximum(h, 0.0).astype(compute_dtype)
    # Layer 2
    h = jnp.dot(h, w2_ref[...], preferred_element_type=jnp.float32) + b2_ref[...]
    h = jnp.maximum(h, 0.0).astype(compute_dtype)
    # Layer 3
    h = jnp.dot(h, w3_ref[...], preferred_element_type=jnp.float32) + b3_ref[...]
    h = jnp.maximum(h, 0.0).astype(compute_dtype)
    # Output layer (logits, no activation), lane-padded to a multiple of 128.
    h = jnp.dot(h, w4_ref[...], preferred_element_type=jnp.float32) + b4_ref[...]
    o_ref[...] = h.astype(o_ref.dtype)


@functools.partial(jax.jit, static_argnames=("batch_tile", "compute_dtype"))
def pair_model_forward(x1, x2, params, *, batch_tile=256,
                       compute_dtype=jnp.bfloat16):
    """Fused forward of PairModel's Encoder.  x1, x2: f32 [B, D] -> logits [B, out_dim]."""
    w1a, w1b, b1, w2, b2, w3, b3, w4, b4 = params
    B, D = x1.shape
    C1, C2, C3, OUT = w1a.shape[1], w2.shape[1], w3.shape[1], w4.shape[1]

    # ---- lane-dense padding of feature dims (exact: zero padding) ----
    C1p = _round_up(C1, _LANE)
    C2p = _round_up(C2, _LANE)
    C3p = _round_up(C3, _LANE)
    OUTp = _round_up(OUT, _LANE)

    def pad2(w, rows, cols):
        return jnp.pad(w, ((0, rows - w.shape[0]), (0, cols - w.shape[1])))

    w1a_p = pad2(w1a, D, C1p).astype(compute_dtype)
    w1b_p = pad2(w1b, D, C1p).astype(compute_dtype)
    w2_p = pad2(w2, C1p, C2p).astype(compute_dtype)
    w3_p = pad2(w3, C2p, C3p).astype(compute_dtype)
    w4_p = pad2(w4, C3p, OUTp).astype(compute_dtype)
    b1_p = pad2(b1, 1, C1p).astype(jnp.float32)
    b2_p = pad2(b2, 1, C2p).astype(jnp.float32)
    b3_p = pad2(b3, 1, C3p).astype(jnp.float32)
    b4_p = pad2(b4, 1, OUTp).astype(jnp.float32)

    # ---- batch padding so the grid tiles evenly ----
    B_pad = _round_up(max(B, 1), batch_tile)
    if B_pad != B:
        x1 = jnp.pad(x1, ((0, B_pad - B), (0, 0)))
        x2 = jnp.pad(x2, ((0, B_pad - B), (0, 0)))
    x1 = x1.astype(compute_dtype)
    x2 = x2.astype(compute_dtype)

    grid = (B_pad // batch_tile,)

    # Weights / biases are tiny: keep them fully resident in VMEM (no
    # per-grid-step DMA, no double buffers).
    def resident():
        return pl.BlockSpec(memory_space=pltpu.MemorySpace.VMEM)

    out_padded = pl.pallas_call(
        _encoder_kernel,
        out_shape=jax.ShapeDtypeStruct((B_pad, OUTp), jnp.float32),
        grid_spec=pltpu.PrefetchScalarGridSpec(
            num_scalar_prefetch=0,
            grid=grid,
            in_specs=[
                pl.BlockSpec((batch_tile, D), lambda i: (i, 0)),   # x1
                pl.BlockSpec((batch_tile, D), lambda i: (i, 0)),   # x2
                resident(),                                        # W1a
                resident(),                                        # W1b
                resident(),                                        # b1
                resident(),                                        # W2
                resident(),                                        # b2
                resident(),                                        # W3
                resident(),                                        # b3
                resident(),                                        # W4
                resident(),                                        # b4
            ],
            out_specs=pl.BlockSpec((batch_tile, OUTp), lambda i: (i, 0)),
        ),
        compiler_params=pltpu.CompilerParams(
            dimension_semantics=("parallel",),
            vmem_limit_bytes=64 * 1024 * 1024,
        ),
    )(x1, x2, w1a_p, w1b_p, b1_p, w2_p, b2_p, w3_p, b3_p, w4_p, b4_p)

    # Strip the batch + lane padding.
    return out_padded[:B, :OUT]


def init_params(key, input_dim, channels, out_dim):
    """Deterministic init mimicking PyTorch nn.Linear default (U[-1/sqrt(fan_in), +])."""
    dims = [2 * input_dim] + list(channels) + [out_dim]
    keys = jax.random.split(key, 2 * (len(dims) - 1))
    ws, bs = [], []
    for li in range(len(dims) - 1):
        fan_in, fan_out = dims[li], dims[li + 1]
        bound = 1.0 / jnp.sqrt(jnp.float32(fan_in))
        w = jax.random.uniform(keys[2 * li], (fan_in, fan_out),
                               minval=-bound, maxval=bound, dtype=jnp.float32)
        b = jax.random.uniform(keys[2 * li + 1], (1, fan_out),
                               minval=-bound, maxval=bound, dtype=jnp.float32)
        ws.append(w)
        bs.append(b)
    # Split the first weight into the x1-half and x2-half (concat folding).
    w1a = ws[0][:input_dim, :]
    w1b = ws[0][input_dim:, :]
    return (w1a, w1b, bs[0], ws[1], bs[1], ws[2], bs[2], ws[3], bs[3])


def reference_forward(x1, x2, params, compute_dtype=jnp.bfloat16):
    """Plain-JAX reference with the same compute-dtype casts as the kernel."""
    w1a, w1b, b1, w2, b2, w3, b3, w4, b4 = params

    def mm(a, w):
        return jnp.dot(a.astype(compute_dtype), w.astype(compute_dtype),
                       preferred_element_type=jnp.float32)

    h = jnp.maximum(mm(x1, w1a) + mm(x2, w1b) + b1, 0.0)
    h = jnp.maximum(mm(h, w2) + b2, 0.0)
    h = jnp.maximum(mm(h, w3) + b3, 0.0)
    return mm(h, w4) + b4


if __name__ == "__main__":
    # Small shapes consistent with the module: the real hidden widths
    # channels=[200, 50, 20] and out_dim=2, with input_dim scaled down and a
    # batch that is deliberately NOT a multiple of the tile to exercise padding.
    B = 300
    INPUT_DIM = 128
    CHANNELS = (200, 50, 20)
    OUT_DIM = 2
    BATCH_TILE = 256

    key = jax.random.PRNGKey(0)
    k_x1, k_x2, k_p = jax.random.split(key, 3)
    x1 = jax.random.normal(k_x1, (B, INPUT_DIM), dtype=jnp.float32)
    x2 = jax.random.normal(k_x2, (B, INPUT_DIM), dtype=jnp.float32)
    params = init_params(k_p, INPUT_DIM, CHANNELS, OUT_DIM)

    out = pair_model_forward(x1, x2, params, batch_tile=BATCH_TILE,
                             compute_dtype=jnp.bfloat16)
    out = jax.block_until_ready(out)

    ref = reference_forward(x1, x2, params, compute_dtype=jnp.bfloat16)
    assert out.shape == (B, OUT_DIM)
    assert jnp.allclose(out, ref, atol=1e-2, rtol=1e-2), "mismatch vs reference"

    print("KERNEL_OK")
</pallas_src>

<mosaic_0001>
module attributes {stable_mosaic.version = 11 : i64} {
  func.func @_encoder_kernel(%arg0: i32, %arg1: memref<256x128xbf16, #tpu.memory_space<vmem>>, %arg2: memref<256x128xbf16, #tpu.memory_space<vmem>>, %arg3: memref<128x256xbf16, #tpu.memory_space<vmem>>, %arg4: memref<128x256xbf16, #tpu.memory_space<vmem>>, %arg5: memref<1x256xf32, #tpu.memory_space<vmem>>, %arg6: memref<256x128xbf16, #tpu.memory_space<vmem>>, %arg7: memref<1x128xf32, #tpu.memory_space<vmem>>, %arg8: memref<128x128xbf16, #tpu.memory_space<vmem>>, %arg9: memref<1x128xf32, #tpu.memory_space<vmem>>, %arg10: memref<128x128xbf16, #tpu.memory_space<vmem>>, %arg11: memref<1x128xf32, #tpu.memory_space<vmem>>, %arg12: memref<256x128xf32, #tpu.memory_space<vmem>>) attributes {dimension_semantics = [#tpu.dimension_semantics<parallel>], iteration_bounds = array<i64: 2>, scalar_prefetch = 0 : i64, scratch_operands = 0 : i64, tpu.core_type = #tpu.core_type<tc>, window_params = [{transform_indices = @transform_0, window_bounds = array<i64: 256, 128>}, {transform_indices = @transform_1, window_bounds = array<i64: 256, 128>}, {pipeline_mode = #tpu.pipeline_mode<synchronous>, transform_indices = @transform_2, window_bounds = array<i64: 128, 256>}, {pipeline_mode = #tpu.pipeline_mode<synchronous>, transform_indices = @transform_3, window_bounds = array<i64: 128, 256>}, {pipeline_mode = #tpu.pipeline_mode<synchronous>, transform_indices = @transform_4, window_bounds = array<i64: 1, 256>}, {pipeline_mode = #tpu.pipeline_mode<synchronous>, transform_indices = @transform_5, window_bounds = array<i64: 256, 128>}, {pipeline_mode = #tpu.pipeline_mode<synchronous>, transform_indices = @transform_6, window_bounds = array<i64: 1, 128>}, {pipeline_mode = #tpu.pipeline_mode<synchronous>, transform_indices = @transform_7, window_bounds = array<i64: 128, 128>}, {pipeline_mode = #tpu.pipeline_mode<synchronous>, transform_indices = @transform_8, window_bounds = array<i64: 1, 128>}, {pipeline_mode = #tpu.pipeline_mode<synchronous>, transform_indices = @transform_9, window_bounds = array<i64: 128, 128>}, {pipeline_mode = #tpu.pipeline_mode<synchronous>, transform_indices = @transform_10, window_bounds = array<i64: 1, 128>}, {transform_indices = @transform_11, window_bounds = array<i64: 256, 128>}]} {
    %c0 = arith.constant 0 : index
    %c0_0 = arith.constant 0 : index
    %0 = vector.load %arg1[%c0, %c0_0] : memref<256x128xbf16, #tpu.memory_space<vmem>>, vector<256x128xbf16>
    %c0_1 = arith.constant 0 : index
    %c0_2 = arith.constant 0 : index
    %1 = vector.load %arg3[%c0_1, %c0_2] : memref<128x256xbf16, #tpu.memory_space<vmem>>, vector<128x256xbf16>
    %cst = arith.constant dense<0.000000e+00> : vector<256x256xf32>
    %2 = tpu.matmul %0, %1, %cst {dimension_numbers = #tpu.dot_dimension_numbers<[1], [0], [0], [1], [0, 0, 1, 1], [], []>} : vector<256x128xbf16>, vector<128x256xbf16>, vector<256x256xf32> -> vector<256x256xf32>
    %c0_3 = arith.constant 0 : index
    %c0_4 = arith.constant 0 : index
    %3 = vector.load %arg2[%c0_3, %c0_4] : memref<256x128xbf16, #tpu.memory_space<vmem>>, vector<256x128xbf16>
    %c0_5 = arith.constant 0 : index
    %c0_6 = arith.constant 0 : index
    %4 = vector.load %arg4[%c0_5, %c0_6] : memref<128x256xbf16, #tpu.memory_space<vmem>>, vector<128x256xbf16>
    %cst_7 = arith.constant dense<0.000000e+00> : vector<256x256xf32>
    %5 = tpu.matmul %3, %4, %cst_7 {dimension_numbers = #tpu.dot_dimension_numbers<[1], [0], [0], [1], [0, 0, 1, 1], [], []>} : vector<256x128xbf16>, vector<128x256xbf16>, vector<256x256xf32> -> vector<256x256xf32>
    %6 = arith.addf %2, %5 : vector<256x256xf32>
    %c0_8 = arith.constant 0 : index
    %c0_9 = arith.constant 0 : index
    %7 = vector.load %arg5[%c0_8, %c0_9] : memref<1x256xf32, #tpu.memory_space<vmem>>, vector<1x256xf32>
    %8 = vector.broadcast %7 : vector<1x256xf32> to vector<256x256xf32>
    %9 = arith.addf %6, %8 : vector<256x256xf32>
    %cst_10 = arith.constant 0.000000e+00 : f32
    %10 = vector.broadcast %cst_10 : f32 to vector<256x256xf32>
    %11 = arith.maximumf %9, %10 : vector<256x256xf32>
    %12 = arith.truncf %11 : vector<256x256xf32> to vector<256x256xbf16>
    %c0_11 = arith.constant 0 : index
    %c0_12 = arith.constant 0 : index
    %13 = vector.load %arg6[%c0_11, %c0_12] : memref<256x128xbf16, #tpu.memory_space<vmem>>, vector<256x128xbf16>
    %cst_13 = arith.constant dense<0.000000e+00> : vector<256x128xf32>
    %14 = tpu.matmul %12, %13, %cst_13 {dimension_numbers = #tpu.dot_dimension_numbers<[1], [0], [0], [1], [0, 0, 1, 1], [], []>} : vector<256x256xbf16>, vector<256x128xbf16>, vector<256x128xf32> -> vector<256x128xf32>
    %c0_14 = arith.constant 0 : index
    %c0_15 = arith.constant 0 : index
    %15 = vector.load %arg7[%c0_14, %c0_15] : memref<1x128xf32, #tpu.memory_space<vmem>>, vector<1x128xf32>
    %16 = vector.broadcast %15 : vector<1x128xf32> to vector<256x128xf32>
    %17 = arith.addf %14, %16 : vector<256x128xf32>
    %cst_16 = arith.constant 0.000000e+00 : f32
    %18 = vector.broadcast %cst_16 : f32 to vector<256x128xf32>
    %19 = arith.maximumf %17, %18 : vector<256x128xf32>
    %20 = arith.truncf %19 : vector<256x128xf32> to vector<256x128xbf16>
    %c0_17 = arith.constant 0 : index
    %c0_18 = arith.constant 0 : index
    %21 = vector.load %arg8[%c0_17, %c0_18] : memref<128x128xbf16, #tpu.memory_space<vmem>>, vector<128x128xbf16>
    %cst_19 = arith.constant dense<0.000000e+00> : vector<256x128xf32>
    %22 = tpu.matmul %20, %21, %cst_19 {dimension_numbers = #tpu.dot_dimension_numbers<[1], [0], [0], [1], [0, 0, 1, 1], [], []>} : vector<256x128xbf16>, vector<128x128xbf16>, vector<256x128xf32> -> vector<256x128xf32>
    %c0_20 = arith.constant 0 : index
    %c0_21 = arith.constant 0 : index
    %23 = vector.load %arg9[%c0_20, %c0_21] : memref<1x128xf32, #tpu.memory_space<vmem>>, vector<1x128xf32>
    %24 = vector.broadcast %23 : vector<1x128xf32> to vector<256x128xf32>
    %25 = arith.addf %22, %24 : vector<256x128xf32>
    %cst_22 = arith.constant 0.000000e+00 : f32
    %26 = vector.broadcast %cst_22 : f32 to vector<256x128xf32>
    %27 = arith.maximumf %25, %26 : vector<256x128xf32>
    %28 = arith.truncf %27 : vector<256x128xf32> to vector<256x128xbf16>
    %c0_23 = arith.constant 0 : index
    %c0_24 = arith.constant 0 : index
    %29 = vector.load %arg10[%c0_23, %c0_24] : memref<128x128xbf16, #tpu.memory_space<vmem>>, vector<128x128xbf16>
    %cst_25 = arith.constant dense<0.000000e+00> : vector<256x128xf32>
    %30 = tpu.matmul %28, %29, %cst_25 {dimension_numbers = #tpu.dot_dimension_numbers<[1], [0], [0], [1], [0, 0, 1, 1], [], []>} : vector<256x128xbf16>, vector<128x128xbf16>, vector<256x128xf32> -> vector<256x128xf32>
    %c0_26 = arith.constant 0 : index
    %c0_27 = arith.constant 0 : index
    %31 = vector.load %arg11[%c0_26, %c0_27] : memref<1x128xf32, #tpu.memory_space<vmem>>, vector<1x128xf32>
    %32 = vector.broadcast %31 : vector<1x128xf32> to vector<256x128xf32>
    %33 = arith.addf %30, %32 : vector<256x128xf32>
    %c0_28 = arith.constant 0 : index
    %c0_29 = arith.constant 0 : index
    %34 = vector.load %arg12[%c0_28, %c0_29] : memref<256x128xf32, #tpu.memory_space<vmem>>, vector<256x128xf32>
    tpu.vector_store %arg12[%c0_28, %c0_29], %33 {strides = array<i32>} : memref<256x128xf32, #tpu.memory_space<vmem>>, vector<256x128xf32>,
    return
  }
  func.func @transform_0(%arg0: i32) -> (i32, i32) {
    %c0_i32 = arith.constant 0 : i32
    %c0_i32_0 = arith.constant 0 : i32
    return %arg0, %c0_i32 : i32, i32
  }
  func.func @transform_1(%arg0: i32) -> (i32, i32) {
    %c0_i32 = arith.constant 0 : i32
    %c0_i32_0 = arith.constant 0 : i32
    return %arg0, %c0_i32 : i32, i32
  }
  func.func @transform_2(%arg0: i32) -> (i32, i32) {
    %c0_i32 = arith.constant 0 : i32
    %c0_i32_0 = arith.constant 0 : i32
    %c0_i32_1 = arith.constant 0 : i32
    return %c0_i32, %c0_i32_0 : i32, i32
  }
  func.func @transform_3(%arg0: i32) -> (i32, i32) {
    %c0_i32 = arith.constant 0 : i32
    %c0_i32_0 = arith.constant 0 : i32
    %c0_i32_1 = arith.constant 0 : i32
    return %c0_i32, %c0_i32_0 : i32, i32
  }
  func.func @transform_4(%arg0: i32) -> (i32, i32) {
    %c0_i32 = arith.constant 0 : i32
    %c0_i32_0 = arith.constant 0 : i32
    %c0_i32_1 = arith.constant 0 : i32
    return %c0_i32, %c0_i32_0 : i32, i32
  }
  func.func @transform_5(%arg0: i32) -> (i32, i32) {
    %c0_i32 = arith.constant 0 : i32
    %c0_i32_0 = arith.constant 0 : i32
    %c0_i32_1 = arith.constant 0 : i32
    return %c0_i32, %c0_i32_0 : i32, i32
  }
  func.func @transform_6(%arg0: i32) -> (i32, i32) {
    %c0_i32 = arith.constant 0 : i32
    %c0_i32_0 = arith.constant 0 : i32
    %c0_i32_1 = arith.constant 0 : i32
    return %c0_i32, %c0_i32_0 : i32, i32
  }
  func.func @transform_7(%arg0: i32) -> (i32, i32) {
    %c0_i32 = arith.constant 0 : i32
    %c0_i32_0 = arith.constant 0 : i32
    %c0_i32_1 = arith.constant 0 : i32
    return %c0_i32, %c0_i32_0 : i32, i32
  }
  func.func @transform_8(%arg0: i32) -> (i32, i32) {
    %c0_i32 = arith.constant 0 : i32
    %c0_i32_0 = arith.constant 0 : i32
    %c0_i32_1 = arith.constant 0 : i32
    return %c0_i32, %c0_i32_0 : i32, i32
  }
  func.func @transform_9(%arg0: i32) -> (i32, i32) {
    %c0_i32 = arith.constant 0 : i32
    %c0_i32_0 = arith.constant 0 : i32
    %c0_i32_1 = arith.constant 0 : i32
    return %c0_i32, %c0_i32_0 : i32, i32
  }
  func.func @transform_10(%arg0: i32) -> (i32, i32) {
    %c0_i32 = arith.constant 0 : i32
    %c0_i32_0 = arith.constant 0 : i32
    %c0_i32_1 = arith.constant 0 : i32
    return %c0_i32, %c0_i32_0 : i32, i32
  }
  func.func @transform_11(%arg0: i32) -> (i32, i32) {
    %c0_i32 = arith.constant 0 : i32
    %c0_i32_0 = arith.constant 0 : i32
    return %arg0, %c0_i32 : i32, i32
  }
}

</mosaic_0001>

<bundles_post_ra>
// kernel: pair_model_forward.1
= control target key start
LH: loop header
LB: loop body
LE: loop exit
PB: predicated region body
PF: predicated region fallthrough
CT: control target
= control target key end

     0   :  { %s4575_s0 = inlined_call_operand.hbm [shape: bf16[512,128], index: 0, kind: input, shape index: {}]   ;;  %s4576_s1 = inlined_call_operand.hbm [shape: bf16[512,128], index: 1, kind: input, shape index: {}]   ;;  %s4577_s2 = inlined_call_operand.hbm [shape: bf16[128,256], index: 2, kind: input, shape index: {}]   ;;  %s4578_s3 = inlined_call_operand.hbm [shape: bf16[128,256], index: 3, kind: input, shape index: {}]   ;;  %s4579_s4 = inlined_call_operand.hbm [shape: f32[1,256], index: 4, kind: input, shape index: {}]   ;;  %s4580_s5 = inlined_call_operand.hbm [shape: bf16[256,128], index: 5, kind: input, shape index: {}]   ;;  %s4581_s6 = inlined_call_operand.hbm [shape: f32[1,128], index: 6, kind: input, shape index: {}]   ;;  %s4582_s7 = inlined_call_operand.hbm [shape: bf16[128,128], index: 7, kind: input, shape index: {}]   ;;  %s4583_s8 = inlined_call_operand.hbm [shape: f32[1,128], index: 8, kind: input, shape index: {}]   ;;  %s4584_s9 = inlined_call_operand.hbm [shape: bf16[128,128], index: 9, kind: input, shape index: {}]   ;;  %s4585_s10 = inlined_call_operand.hbm [shape: f32[1,128], index: 10, kind: input, shape index: {}]   ;;  %s4586_s11 = inlined_call_operand.hbm [shape: f32[512,128], index: 11, kind: output, shape index: {}]  }
   0x1   :  { %4597 = sst [smem:[#allocation30_spill]] %s4575_s0 }
   0x2   :  { %4598 = sst [smem:[#allocation31_spill]] %s4576_s1 }
   0x3   :  { %4599 = sst [smem:[#allocation32_spill]] %s4577_s2 }
   0x4   :  { %4600 = sst [smem:[#allocation33_spill]] %s4578_s3 }
   0x5   :  { %4601 = sst [smem:[#allocation34_spill]] %s4579_s4 }
   0x6   :  { %4602 = sst [smem:[#allocation35_spill]] %s4580_s5 }
   0x7   :  { %4603 = sst [smem:[#allocation36_spill]] %s4581_s6 }
   0x8   :  { %4604 = sst [smem:[#allocation37_spill]] %s4582_s7 }
   0x9   :  { %4605 = sst [smem:[#allocation38_spill]] %s4583_s8 }
   0xa   :  { %4606 = sst [smem:[#allocation39_spill]] %s4586_s11 }
   0xb   :  { %16 = vsyncpa [#allocation3], 0 }
   0xc   :  { %18 = vsyncpa [#allocation3 + $0x1], 0 }
   0xd   :  { %19 = vsyncpa [#allocation6], 0 }
   0xe   :  { %21 = vsyncpa [#allocation6 + $0x1], 0 }
   0xf   :  { %22 = vsyncpa [#allocation9], 0 }
  0x10   :  { %23 = vsyncpa [#allocation12], 0 }
  0x11   :  { %24 = vsyncpa [#allocation15], 0 }
  0x12   :  { %25 = vsyncpa [#allocation18], 0 }
  0x13   :  { %26 = vsyncpa [#allocation4], 0 }
  0x14   :  { %28 = vsyncpa [#allocation4 + $0x1], 0  ;;  %s3862_s17 = smov 0   ;;  %s3864_s18 = smov 0  }
  0x15   :  { %s3866_s19 = smov 0   ;;  %s3868_s20 = smov 0  }
  0x16 LB: > { %s3783_s21 = smov [#allocation7]   ;;  %s3883_s23 = sadd.s32 4294967295, %s3781_s20   ;;  %s3781_s20 = sphi %s3868_s20, %s4646_s20   ;;  %s3777_s19 = sphi %s3866_s19, %s4645_s19   ;;  %s3773_s18 = sphi %s3864_s18, %s4644_s18   ;;  %s3769_s17 = sphi %s3862_s17, %s4643_s17  }
  0x17   : > { %s318_s22 = sshll.u32 %s3783_s21, 4  ;;  %p2661_p0 = scmp.ge.s32.totalorder %s3781_s20, 1  ;;  %s3888_s22 = int_to_ptr.vmem [resolvable:$true] %s318_s22 }
  0x18   : > { %p4590_p1 = scmp.eq.s32.totalorder %s3883_s23, 0  ;;  %p306_p2 = scmp.lt.s32.totalorder %s3781_s20, 3 }
  0x19   : > { %s3784_s25 = smov [#allocation8]   ;;  %s3785_s28 = smov [#allocation11]  }
  0x1a   : > { %p3890_p3 = pnand %p2661_p0, %p306_p2  ;;  %s331_s26 = sshll.u32 %s3784_s25, 4  ;;  %s3903_s26 = int_to_ptr.vmem [resolvable:$true] %s331_s26 }
  0x1b   : > { %s355_s29 = sshll.u32 %s3785_s28, 4  ;;  %s4610_s2 = sld [smem:[#allocation32_spill]]  ;;  %s3905_s29 = int_to_ptr.vmem [resolvable:$true] %s355_s29 }
  0x1c   : > { %s4607_s24 = scalar_select %p3890_p3, 1, 0 }
  0x1d   : > { %p3160_p5 = pneg %p3890_p3 }
  0x1e   : > { %4608 = sst [smem:[#allocation29_spill]] %s4607_s24 }
  0x1f   : > { %p3899_p6 = pnand %p3160_p5, %p4590_p1 }
  0x21   : > { %s3379_s13 = scalar_lea.hbm %s4610_s2, 2048  ;;  %p3915_p8 = pneg %p3899_p6 }
  0x22   : > { %p3380_p7 = scmp.ne.s32.totalorder %s4610_s2, %s3379_s13  ;;  %p3386_p11 = scmp.lt.u32.totalorder %s3379_s13, %s4610_s2 }
  0x24   : > { %p3382_p9 = pnand %p3915_p8, %p3380_p7 }
  0x26   : > { %p3383_p10 = pneg %p3382_p9 }
  0x28   : > { %p3388_p12 = pnand %p3386_p11, %p3383_p10 }
  0x2a   : > { %3391 = shalt.err (!%p3388_p12)
}
  0x2b   : > { %s3392_s28 = scalar_lea.vmem %s3888_s22, 2048  ;;  %p3400_p5 = scmp.lt.s32.totalorder %s3888_s22, %s3888_s22 }
  0x2c   : > { %p3393_p13 = scmp.ne.s32.totalorder %s3888_s22, %s3392_s28  ;;  %p3401_p4 = scmp.lt.s32.totalorder %s3392_s28, %s3392_s28 }
  0x2e   : > { %p3395_p0 = pnand %p3393_p13, %p3915_p8  ;;  %p3402_p7 = por %p3401_p4, %p3400_p5 }
  0x30   : > { %p3396_p2 = pneg %p3395_p0 }
  0x32   : > { %p3403_p9 = pnand %p3402_p7, %p3396_p2 }
  0x34   : > { %3406 = shalt.err (!%p3403_p9)
}
  0x35   : > { %s3786_s30 = smov 128   ;;  %s3787_s12 = smov 8  }
  0x36   : > { %3163 = dma.hbm_to_vmem [thread:$0]  (!%p3899_p6), %s4610_s2, 2048, %s3888_s22, [#allocation6], %s3786_s30, %s3786_s30, %s3787_s12  }
  0x37   : > { %s4612_s3 = sld [smem:[#allocation33_spill]] }
  0x3d   : > { %s3407_s25 = scalar_lea.hbm %s4612_s3, 2048 }
  0x3e   : > { %p3408_p4 = scmp.ne.s32.totalorder %s4612_s3, %s3407_s25  ;;  %p3414_p12 = scmp.lt.u32.totalorder %s3407_s25, %s4612_s3 }
  0x40   : > { %p3410_p10 = pnand %p3408_p4, %p3915_p8 }
  0x42   : > { %p3411_p11 = pneg %p3410_p10 }
  0x44   : > { %p3416_p13 = pnand %p3414_p12, %p3411_p11 }
  0x46   : > { %3419 = shalt.err (!%p3416_p13)
}
  0x47   : > { %s3420_s22 = scalar_lea.vmem %s3903_s26, 2048  ;;  %p3428_p7 = scmp.lt.s32.totalorder %s3903_s26, %s3903_s26 }
  0x48   : > { %p3421_p0 = scmp.ne.s32.totalorder %s3903_s26, %s3420_s22  ;;  %p3429_p9 = scmp.lt.s32.totalorder %s3420_s22, %s3420_s22 }
  0x4a   : > { %p3423_p2 = pnand %p3421_p0, %p3915_p8  ;;  %p3430_p4 = por %p3429_p9, %p3428_p7 }
  0x4c   : > { %p3424_p5 = pneg %p3423_p2 }
  0x4e   : > { %p3431_p10 = pnand %p3430_p4, %p3424_p5 }
  0x50   : > { %3434 = shalt.err (!%p3431_p10)
}
  0x51   : > { %3166 = dma.hbm_to_vmem [thread:$0]  (!%p3899_p6), %s4612_s3, 2048, %s3903_s26, [#allocation9], %s3786_s30, %s3786_s30, %s3787_s12  }
  0x52   : > { %s4613_s5 = sld [smem:[#allocation35_spill]] }
  0x58   : > { %s3435_s14 = scalar_lea.hbm %s4613_s5, 2048 }
  0x59   : > { %p3436_p11 = scmp.ne.s32.totalorder %s4613_s5, %s3435_s14  ;;  %p3442_p0 = scmp.lt.u32.totalorder %s3435_s14, %s4613_s5 }
  0x5b   : > { %p3438_p12 = pnand %p3436_p11, %p3915_p8 }
  0x5d   : > { %p3439_p13 = pneg %p3438_p12 }
  0x5f   : > { %p3444_p2 = pnand %p3442_p0, %p3439_p13 }
  0x61   : > { %3447 = shalt.err (!%p3444_p2)
}
  0x62   : > { %s3448_s26 = scalar_lea.vmem %s3905_s29, 2048  ;;  %p3456_p4 = scmp.lt.s32.totalorder %s3905_s29, %s3905_s29 }
  0x63   : > { %p3449_p5 = scmp.ne.s32.totalorder %s3905_s29, %s3448_s26  ;;  %p3457_p10 = scmp.lt.s32.totalorder %s3448_s26, %s3448_s26 }
  0x65   : > { %p3451_p7 = pnand %p3449_p5, %p3915_p8  ;;  %p3458_p11 = por %p3457_p10, %p3456_p4 }
  0x67   : > { %p3452_p9 = pneg %p3451_p7 }
  0x69   : > { %p3459_p12 = pnand %p3458_p11, %p3452_p9 }
  0x6b   : > { %3462 = shalt.err (!%p3459_p12)
}
  0x6c   : > { %s4592_s30 = smov 64   ;;  %s4594_s12 = smov 4  }
  0x6d   : > { %3172 = dma.hbm_to_vmem [thread:$0]  (!%p3899_p6), %s4613_s5, 2048, %s3905_s29, [#allocation12], %s4592_s30, %s4592_s30, %s4594_s12  }
  0x6e   : > { %s3790_s11 = smov [#allocation14]   ;;  %s3791_s13 = smov [#allocation17]  }
  0x6f   : > { %s379_s24 = sshll.u32 %s3790_s11, 4  ;;  %s403_s14 = sshll.u32 %s3791_s13, 4  ;;  %s380_s24 = int_to_ptr.vmem [resolvable:$true] %s379_s24  ;;  %s404_s14 = int_to_ptr.vmem [resolvable:$true] %s403_s14 }
  0x70   : > { %s4614_s7 = sld [smem:[#allocation37_spill]] }
  0x76   : > { %s3463_s25 = scalar_lea.hbm %s4614_s7, 1024 }
  0x77   : > { %p3464_p13 = scmp.ne.s32.totalorder %s4614_s7, %s3463_s25  ;;  %p3470_p5 = scmp.lt.u32.totalorder %s3463_s25, %s4614_s7 }
  0x79   : > { %p3466_p0 = pnand %p3464_p13, %p3915_p8 }
  0x7b   : > { %p3467_p2 = pneg %p3466_p0 }
  0x7d   : > { %p3472_p7 = pnand %p3470_p5, %p3467_p2 }
  0x7f   : > { %3475 = shalt.err (!%p3472_p7)
}
  0x80   : > { %s3476_s29 = scalar_lea.vmem %s380_s24, 1024  ;;  %p3484_p11 = scmp.lt.s32.totalorder %s380_s24, %s380_s24 }
  0x81   : > { %p3477_p9 = scmp.ne.s32.totalorder %s380_s24, %s3476_s29  ;;  %p3485_p12 = scmp.lt.s32.totalorder %s3476_s29, %s3476_s29 }
  0x83   : > { %p3479_p4 = pnand %p3477_p9, %p3915_p8  ;;  %p3486_p1 = por %p3485_p12, %p3484_p11 }
  0x85   : > { %p3480_p10 = pneg %p3479_p4 }
  0x87   : > { %p3487_p3 = pnand %p3486_p1, %p3480_p10 }
  0x89   : > { %3490 = shalt.err (!%p3487_p3)
}
  0x8a   : > { %3178 = dma.hbm_to_vmem [thread:$0]  (!%p3899_p6), %s4614_s7, 1024, %s380_s24, [#allocation15], %s4592_s30, %s4592_s30, %s4594_s12  }
  0x8b   : > { %s3491_s11 = scalar_lea.hbm %s4584_s9, 1024 }
  0x8c   : > { %p3492_p1 = scmp.ne.s32.totalorder %s4584_s9, %s3491_s11  ;;  %p3498_p0 = scmp.lt.u32.totalorder %s3491_s11, %s4584_s9 }
  0x8e   : > { %p3494_p3 = pnand %p3492_p1, %p3915_p8 }
  0x90   : > { %p3495_p13 = pneg %p3494_p3 }
  0x92   : > { %p3500_p2 = pnand %p3498_p0, %p3495_p13 }
  0x94   : > { %3503 = shalt.err (!%p3500_p2)
}
  0x95   : > { %s3504_s28 = scalar_lea.vmem %s404_s14, 1024  ;;  %p3512_p4 = scmp.lt.s32.totalorder %s404_s14, %s404_s14 }
  0x96   : > { %p3505_p5 = scmp.ne.s32.totalorder %s404_s14, %s3504_s28  ;;  %p3513_p10 = scmp.lt.s32.totalorder %s3504_s28, %s3504_s28 }
  0x98   : > { %p3507_p7 = pnand %p3505_p5, %p3915_p8  ;;  %p3514_p11 = por %p3513_p10, %p3512_p4 }
  0x9a   : > { %p3508_p9 = pneg %p3507_p7 }
  0x9c   : > { %p3515_p12 = pnand %p3514_p11, %p3508_p9 }
  0x9e   : > { %3518 = shalt.err (!%p3515_p12)
}
  0x9f   : > { %3184 = dma.hbm_to_vmem [thread:$0]  (!%p3899_p6), %s4584_s9, 1024, %s404_s14, [#allocation18], %s4592_s30, %s4592_s30, %s4594_s12  }
  0xa0   : > { %s3792_s29 = smov [#allocation10]   ;;  %s3793_s3 = smov [#allocation13]  }
  0xa1   : > { %s345_s2 = sshll.u32 %s3792_s29, 4  ;;  %s369_s22 = sshll.u32 %s3793_s3, 4  ;;  %s346_s2 = int_to_ptr.vmem [resolvable:$true] %s345_s2  ;;  %s370_s22 = int_to_ptr.vmem [resolvable:$true] %s369_s22 }
  0xa2   : > { %s4615_s4 = sld [smem:[#allocation34_spill]] }
  0xa8   : > { %s3519_s13 = scalar_lea.hbm %s4615_s4, 32 }
  0xa9   : > { %p3520_p1 = scmp.ne.s32.totalorder %s4615_s4, %s3519_s13  ;;  %p3526_p0 = scmp.lt.u32.totalorder %s3519_s13, %s4615_s4 }
  0xab   : > { %p3522_p3 = pnand %p3520_p1, %p3915_p8 }
  0xad   : > { %p3523_p13 = pneg %p3522_p3 }
  0xaf   : > { %p3528_p2 = pnand %p3526_p0, %p3523_p13 }
  0xb1   : > { %3531 = shalt.err (!%p3528_p2)
}
  0xb2   : > { %s3532_s14 = scalar_lea.vmem %s346_s2, 32  ;;  %p3540_p4 = scmp.lt.s32.totalorder %s346_s2, %s346_s2 }
  0xb3   : > { %p3533_p5 = scmp.ne.s32.totalorder %s346_s2, %s3532_s14  ;;  %p3541_p10 = scmp.lt.s32.totalorder %s3532_s14, %s3532_s14 }
  0xb5   : > { %p3535_p7 = pnand %p3533_p5, %p3915_p8  ;;  %p3542_p11 = por %p3541_p10, %p3540_p4 }
  0xb7   : > { %p3536_p9 = pneg %p3535_p7 }
  0xb9   : > { %p3543_p12 = pnand %p3542_p11, %p3536_p9 }
  0xbb   : > { %3546 = shalt.err (!%p3543_p12)
}
  0xbc   : > { %3169 = dma.hbm_to_vmem [thread:$0]  (!%p3899_p6), %s4615_s4, 32, %s346_s2, [#allocation9]  }
  0xbd   : > { %s4616_s6 = sld [smem:[#allocation36_spill]] }
  0xc3   : > { %s3547_s1 = scalar_lea.hbm %s4616_s6, 16 }
  0xc4   : > { %p3548_p1 = scmp.ne.s32.totalorder %s4616_s6, %s3547_s1  ;;  %p3554_p0 = scmp.lt.u32.totalorder %s3547_s1, %s4616_s6 }
  0xc6   : > { %p3550_p3 = pnand %p3548_p1, %p3915_p8 }
  0xc8   : > { %p3551_p13 = pneg %p3550_p3 }
  0xca   : > { %p3556_p2 = pnand %p3554_p0, %p3551_p13 }
  0xcc   : > { %3559 = shalt.err (!%p3556_p2)
}
  0xcd   : > { %s3560_s25 = scalar_lea.vmem %s370_s22, 16  ;;  %s3567_s2 = scalar_lea.vmem %s370_s22, 32 }
  0xce   : > { %p3561_p5 = scmp.ne.s32.totalorder %s370_s22, %s3560_s25  ;;  %p3568_p4 = scmp.lt.s32.totalorder %s370_s22, %s370_s22 }
  0xcf   : > { %p3569_p10 = scmp.lt.s32.totalorder %s3567_s2, %s3560_s25 }
  0xd0   : > { %p3563_p7 = pnand %p3561_p5, %p3915_p8 }
  0xd1   : > { %p3570_p11 = por %p3569_p10, %p3568_p4 }
  0xd2   : > { %p3564_p9 = pneg %p3563_p7 }
  0xd4   : > { %p3571_p12 = pnand %p3570_p11, %p3564_p9 }
  0xd6   : > { %3574 = shalt.err (!%p3571_p12)
}
  0xd7   : > { %3175 = dma.hbm_to_vmem [thread:$0]  (!%p3899_p6), %s4616_s6, 16, %s370_s22, [#allocation12]  }
  0xd8   : > { %s3794_s24 = smov [#allocation16]   ;;  %s3795_s29 = smov [#allocation19]  }
  0xd9   : > { %s393_s26 = sshll.u32 %s3794_s24, 4  ;;  %s417_s3 = sshll.u32 %s3795_s29, 4  ;;  %s394_s26 = int_to_ptr.vmem [resolvable:$true] %s393_s26  ;;  %s418_s3 = int_to_ptr.vmem [resolvable:$true] %s417_s3 }
  0xda   : > { %s4617_s8 = sld [smem:[#allocation38_spill]] }
  0xe0   : > { %s3575_s13 = scalar_lea.hbm %s4617_s8, 16 }
  0xe1   : > { %p3576_p1 = scmp.ne.s32.totalorder %s4617_s8, %s3575_s13  ;;  %p3582_p0 = scmp.lt.u32.totalorder %s3575_s13, %s4617_s8 }
  0xe3   : > { %p3578_p3 = pnand %p3576_p1, %p3915_p8 }
  0xe5   : > { %p3579_p13 = pneg %p3578_p3 }
  0xe7   : > { %p3584_p2 = pnand %p3582_p0, %p3579_p13 }
  0xe9   : > { %3587 = shalt.err (!%p3584_p2)
}
  0xea   : > { %s3588_s22 = scalar_lea.vmem %s394_s26, 16  ;;  %s3595_s28 = scalar_lea.vmem %s394_s26, 32 }
  0xeb   : > { %p3589_p5 = scmp.ne.s32.totalorder %s394_s26, %s3588_s22  ;;  %p3596_p4 = scmp.lt.s32.totalorder %s394_s26, %s394_s26 }
  0xec   : > { %p3597_p10 = scmp.lt.s32.totalorder %s3595_s28, %s3588_s22 }
  0xed   : > { %p3591_p7 = pnand %p3589_p5, %p3915_p8 }
  0xee   : > { %p3598_p11 = por %p3597_p10, %p3596_p4 }
  0xef   : > { %p3592_p9 = pneg %p3591_p7 }
  0xf1   : > { %p3599_p12 = pnand %p3598_p11, %p3592_p9 }
  0xf3   : > { %3602 = shalt.err (!%p3599_p12)
}
  0xf4   : > { %3181 = dma.hbm_to_vmem [thread:$0]  (!%p3899_p6), %s4617_s8, 16, %s394_s26, [#allocation15]  }
  0xf5   : > { %s3603_s11 = scalar_lea.hbm %s4585_s10, 16 }
  0xf6   : > { %p3604_p1 = scmp.ne.s32.totalorder %s4585_s10, %s3603_s11  ;;  %p3610_p0 = scmp.lt.u32.totalorder %s3603_s11, %s4585_s10 }
  0xf8   : > { %p3606_p3 = pnand %p3604_p1, %p3915_p8 }
  0xfa   : > { %p3607_p13 = pneg %p3606_p3 }
  0xfc   : > { %p3612_p2 = pnand %p3610_p0, %p3607_p13 }
  0xfe   : > { %3615 = shalt.err (!%p3612_p2)
}
  0xff   : > { %s3616_s2 = scalar_lea.vmem %s418_s3, 16  ;;  %s3623_s26 = scalar_lea.vmem %s418_s3, 32 }
 0x100   : > { %p3617_p5 = scmp.ne.s32.totalorder %s418_s3, %s3616_s2  ;;  %p3624_p4 = scmp.lt.s32.totalorder %s418_s3, %s418_s3 }
 0x101   : > { %p3625_p10 = scmp.lt.s32.totalorder %s3623_s26, %s3616_s2 }
 0x102   : > { %p3619_p7 = pnand %p3617_p5, %p3915_p8 }
 0x103   : > { %p3626_p11 = por %p3625_p10, %p3624_p4 }
 0x104   : > { %p3620_p9 = pneg %p3619_p7 }
 0x106   : > { %p3627_p12 = pnand %p3626_p11, %p3620_p9 }
 0x108   : > { %3630 = shalt.err (!%p3627_p12)
}
 0x109   : > { %3187 = dma.hbm_to_vmem [thread:$0]  (!%p3899_p6), %s4585_s10, 16, %s418_s3, [#allocation18]  }
 0x10a   : > { %s2660_s16 = sadd.s32 4294967294, %s3781_s20   ;;  %s4101_s27 = sadd.s32 1, %s3781_s20  }
 0x10b   : > { %s41_s14 = sadd.s32 1, %s3777_s19  ;;  %s38_s24 = ssub.s32 %s3781_s20, %s4101_s27 }
 0x10c   : > { %p48_p8 = scmp.ne.s32.totalorder %s3777_s19, %s3773_s18  ;;  %p39_p1 = scmp.eq.s32.totalorder %s38_s24, 0 }
 0x10d   : > { %p49_p3 = scmp.eq.s32.totalorder %s3781_s20, 0  ;;  %p54_p13 = scmp.ne.s32.totalorder %s3773_s18, %s3769_s17 }
 0x10e   : > { %p293_p0 = scmp.eq.s32.totalorder %s3883_s23, 1  ;;  %p4618_p5 = scmp.eq.s32.totalorder %s3883_s23, 0 }
 0x10f   : > { %s4113_s29 = scalar_select %p39_p1, %s3777_s19, %s41_s14  }
 0x110   : > { %p50_p2 = por %p49_p3, %p48_p8  ;;  %p4117_p7 = por %p4618_p5, %p54_p13 }
 0x111   : > { %p4121_p6 = por %p293_p0, %p48_p8  ;;  %p299_p9 = scmp.eq.s32.totalorder %s2660_s16, 1 }
 0x112   : > { %p3208_p4 = scmp.lt.s32.totalorder %s3781_s20, 2  ;;  %s428_s11 = sand.u32 1, %s3777_s19  }
 0x113   : > { %s4620_s3 = scalar_select %p4121_p6, 1, 0 }
 0x114   : > { %p4127_p10 = por %p299_p9, %p54_p13  ;;  %s4131_s15 = sshll.u32 %s428_s11, 7 }
 0x115   : > { %s2795_s21 = sshll.u32 %s3781_s20, 11  ;;  %s4622_s0 = sld [smem:[#allocation30_spill]] }
 0x116   : > { %s4621_s13 = scalar_select %p4127_p10, 1, 0 }
 0x117   : > { %s432_s22 = scalar_lea.vmem [#allocation2], %s4131_s15  ;;  %p4140_p11 = pnand %p3208_p4, %p50_p2 }
 0x118   : > { %s439_s28 = sshll.u32 %s432_s22, 4  ;;  %s4624_s30 = sld [smem:[#allocation31_spill]]  ;;  %s4144_s28 = int_to_ptr.vmem [resolvable:$true] %s439_s28 }
 0x119   : > { %s4151_s2 = scalar_lea.sflag [#allocation3], %s428_s11  ;;  %p3633_p8 = pneg %p4140_p11 }
 0x11b   : > { %s4137_s26 = scalar_lea.hbm %s4622_s0, %s2795_s21  ;;  %s3636_s5 = scalar_lea.hbm %s4622_s0, 4096 }
 0x11c   : > { %s3631_s12 = scalar_lea.hbm %s4137_s26, 2048  ;;  %p3637_p13 = scmp.lt.u32.totalorder %s4137_s26, %s4622_s0 }
 0x11d   : > { %p3632_p12 = scmp.ne.s32.totalorder %s4137_s26, %s3631_s12  ;;  %p3638_p0 = scmp.lt.u32.totalorder %s3636_s5, %s3631_s12 }
 0x11e   : > { %s4149_s25 = scalar_lea.hbm %s4624_s30, %s2795_s21  ;;  %p3640_p5 = scmp.lt.u32.totalorder %s3631_s12, %s4137_s26 }
 0x11f   : > { %p3634_p1 = pnand %p3633_p8, %p3632_p12  ;;  %p3639_p2 = por %p3638_p0, %p3637_p13 }
 0x121   : > { %p3635_p3 = pneg %p3634_p1  ;;  %p3641_p9 = por %p3640_p5, %p3639_p2 }
 0x123   : > { %p3642_p4 = pnand %p3641_p9, %p3635_p3 }
 0x125   : > { %3645 = shalt.err (!%p3642_p4)
}
 0x126   : > { %s3646_s11 = scalar_lea.vmem %s4144_s28, 2048  ;;  %s3796_s4 = smov [#allocation2]  }
 0x127   : > { %p3647_p12 = scmp.ne.s32.totalorder %s4144_s28, %s3646_s11  ;;  %s3651_s21 = sshll.u32 %s3796_s4, 4  ;;  %s3652_s21 = int_to_ptr.vmem [resolvable:$false] %s3651_s21 }
 0x128   : > { %s3653_s6 = scalar_lea.vmem %s3652_s21, 4096  ;;  %p3654_p6 = scmp.lt.s32.totalorder %s4144_s28, %s3652_s21 }
 0x129   : > { %p3649_p1 = pnand %p3647_p12, %p3633_p8  ;;  %p3655_p13 = scmp.lt.s32.totalorder %s3653_s6, %s3646_s11 }
 0x12b   : > { %p3650_p10 = pneg %p3649_p1  ;;  %p3656_p0 = por %p3655_p13, %p3654_p6 }
 0x12d   : > { %p3657_p2 = pnand %p3656_p0, %p3650_p10 }
 0x12f   : > { %3660 = shalt.err (!%p3657_p2)
}
 0x130   : > { %s4625_s5 = smov 4   ;;  %s4626_s7 = smov 64  }
 0x131   : > { %3191 = dma.hbm_to_vmem [thread:$0]  (!%p4140_p11), %s4137_s26, 2048, %s4144_s28, %s4151_s2, %s4626_s7, %s4626_s7, %s4625_s5  }
 0x132   : > { %s453_s12 = scalar_lea.vmem [#allocation5], %s4131_s15  ;;  %s449_s24 = sand.u32 1, %s3781_s20  }
 0x133   : > { %s460_s14 = sshll.u32 %s453_s12, 4  ;;  %s4186_s22 = scalar_lea.sflag [#allocation6], %s449_s24  ;;  %s4184_s14 = int_to_ptr.vmem [resolvable:$true] %s460_s14 }
 0x134   : > { %s3661_s11 = scalar_lea.hbm %s4149_s25, 2048  ;;  %s3666_s6 = scalar_lea.hbm %s4624_s30, 4096 }
 0x135   : > { %p3662_p6 = scmp.ne.s32.totalorder %s4149_s25, %s3661_s11  ;;  %p3667_p5 = scmp.lt.u32.totalorder %s4149_s25, %s4624_s30 }
 0x136   : > { %p3668_p9 = scmp.lt.u32.totalorder %s3666_s6, %s3661_s11  ;;  %p3670_p12 = scmp.lt.u32.totalorder %s3661_s11, %s4149_s25 }
 0x137   : > { %p3664_p10 = pnand %p3662_p6, %p3633_p8 }
 0x138   : > { %p3669_p4 = por %p3668_p9, %p3667_p5 }
 0x139   : > { %p3665_p3 = pneg %p3664_p10 }
 0x13a   : > { %p3671_p1 = por %p3670_p12, %p3669_p4 }
 0x13c   : > { %p3672_p13 = pnand %p3671_p1, %p3665_p3 }
 0x13e   : > { %3675 = shalt.err (!%p3672_p13)
}
 0x13f   : > { %s3676_s15 = scalar_lea.vmem %s4184_s14, 2048  ;;  %s3797_s26 = smov [#allocation5]  }
 0x140   : > { %p3677_p0 = scmp.ne.s32.totalorder %s4184_s14, %s3676_s15  ;;  %s3681_s28 = sshll.u32 %s3797_s26, 4  ;;  %s3682_s28 = int_to_ptr.vmem [resolvable:$false] %s3681_s28 }
 0x141   : > { %s3683_s0 = scalar_lea.vmem %s3682_s28, 4096  ;;  %p3684_p10 = scmp.lt.s32.totalorder %s4184_s14, %s3682_s28 }
 0x142   : > { %p3679_p2 = pnand %p3677_p0, %p3633_p8  ;;  %p3685_p5 = scmp.lt.s32.totalorder %s3683_s0, %s3676_s15 }
 0x144   : > { %p3680_p6 = pneg %p3679_p2  ;;  %p3686_p9 = por %p3685_p5, %p3684_p10 }
 0x146   : > { %p3687_p4 = pnand %p3686_p9, %p3680_p6 }
 0x148   : > { %3690 = shalt.err (!%p3687_p4)
}
 0x149   : > { %3194 = dma.hbm_to_vmem [thread:$0]  (!%p4140_p11), %s4149_s25, 2048, %s4184_s14, %s4186_s22, %s4626_s7, %s4626_s7, %s4625_s5  }
 0x14a   : > { %s4627_s8 = sld [smem:[#allocation29_spill]] }
 0x150   : > { %p4628_p8 = scmp.ne.s32.totalorder %s4627_s8, 0 }
 0x151   : > { %s4218_s2 = sand.u32 (!%p4628_p8), 1, %s3773_s18  }
 0x152   : > { %472 = sbr.rel (%p4628_p8) target bundleno = 1545 (0x609), region = 64  ;;  %s2679_s12 = sshll.u32 (!%p4628_p8), %s4218_s2, 7 }
 0x153   : > { %s475_s24 = scalar_lea.sflag (!%p4628_p8), [#allocation3], %s4218_s2  ;;  %s4222_s11 = scalar_lea.vmem (!%p4628_p8), [#allocation2], %s2679_s12 }
 0x159   : > { %3736 = dma.done.wait (%p4117_p7), %s475_s24, 2048  }
 0x15a   : > { %3738 = vsyncadd (%p4117_p7), %s475_s24, 4294965248  ;;  %s483_s16 = sand.u32 1, %s3883_s23   ;;  %s4229_s5 = scalar_lea.vmem [#allocation5], %s2679_s12 }
 0x15b   : > { %s484_s25 = scalar_lea.sflag [#allocation6], %s483_s16 }
 0x15c   : > { %3740 = dma.done.wait (%p4117_p7), %s484_s25, 2048  }
 0x15d   : > { %3742 = vsyncadd (%p4117_p7), %s484_s25, 4294965248  ;;  %p4629_p11 = scmp.eq.s32.totalorder %s3883_s23, 0 }
 0x15f   : > { %3744 = dma.done.wait (%p4629_p11), [#allocation6], 2048   ;;  %p4630_p3 = pmov %p4629_p11 }
 0x161   : > { %3746 = vsyncadd (%p4630_p3), [#allocation6], 4294965248  ;;  %p4631_p12 = pmov %p4630_p3 }
 0x162   : > { %p4632_p1 = pmov %p4630_p3 }
 0x163   : > { %3748 = dma.done.wait (%p4631_p12), [#allocation9], 2080  }
 0x164   : > { %3750 = vsyncadd (%p4632_p1), [#allocation9], 4294965216  ;;  %p4633_p13 = pmov %p4632_p1 }
 0x165   : > { %p4634_p0 = pmov %p4632_p1 }
 0x166   : > { %3752 = dma.done.wait (%p4633_p13), [#allocation12], 2064  }
 0x167   : > { %3754 = vsyncadd (%p4634_p0), [#allocation12], 4294965232  ;;  %p4635_p7 = pmov %p4634_p0 }
 0x168   : > { %p4636_p2 = pmov %p4634_p0 }
 0x169   : > { %3756 = dma.done.wait (%p4635_p7), [#allocation15], 1040  }
 0x16a   : > { %3758 = vsyncadd (%p4636_p2), [#allocation15], 4294966256  ;;  %p4637_p6 = pmov %p4634_p0 }
 0x16b   : > { %p4638_p10 = pmov %p4634_p0 }
 0x16c   : > { %3760 = dma.done.wait (%p4637_p6), [#allocation18], 1040  }
 0x16d   : > { %3762 = vsyncadd (%p4638_p10), [#allocation18], 4294966256  ;;  %v3798_v0 = vmov 0   ;;  %v3267_v1 = vld [vmem:[#allocation8 + $0x4] ss:$8 sps:$4 sm:$0xff]   ;;  %v3296_v28 = vld [vmem:[%s4229_s5 + $0x10] sm:$0xff]  }
 0x16e   : > { %875 = vmatprep.mubr.bf16.mxu0 %v3798_v0  ;;  %v3269_v2 = vld [vmem:[#allocation8] ss:$8 sps:$4 sm:$0xff]   ;;  %843 = vmatprep.subr.bf16.mxu0 %v3267_v1  ;;  %v3270_v3 = vld [vmem:[#allocation8 + $0x14] ss:$8 sps:$4 sm:$0xff]   ;;  %v3272_v4 = vld [vmem:[#allocation8 + $0x10] ss:$8 sps:$4 sm:$0xff]  }
 0x16f   : > { %844 = vmatpush1.bf16.msra.mxu0 %v3269_v2  ;;  %v3273_v5 = vld [vmem:[#allocation8 + $0x24] ss:$8 sps:$4 sm:$0xff]   ;;  %v3275_v6 = vld [vmem:[#allocation8 + $0x20] ss:$8 sps:$4 sm:$0xff]   ;;  %v3276_v7 = vld [vmem:[#allocation8 + $0x34] ss:$8 sps:$4 sm:$0xff]  }
 0x170   : > { %845 = vmatprep.subr.bf16.mxu0 %v3270_v3  ;;  %v3278_v8 = vld [vmem:[#allocation8 + $0x30] ss:$8 sps:$4 sm:$0xff]   ;;  %v3279_v9 = vld [vmem:[#allocation8 + $0x44] ss:$8 sps:$4 sm:$0xff]   ;;  %v3281_v10 = vld [vmem:[#allocation8 + $0x40] ss:$8 sps:$4 sm:$0xff]  }
 0x171   : > { %v3282_v11 = vld [vmem:[#allocation8 + $0x54] ss:$8 sps:$4 sm:$0xff]   ;;  %v3284_v12 = vld [vmem:[#allocation8 + $0x50] ss:$8 sps:$4 sm:$0xff]   ;;  %v3285_v13 = vld [vmem:[#allocation8 + $0x64] ss:$8 sps:$4 sm:$0xff]  }
 0x172   : > { %v3287_v14 = vld [vmem:[#allocation8 + $0x60] ss:$8 sps:$4 sm:$0xff]   ;;  %v3288_v15 = vld [vmem:[#allocation8 + $0x74] ss:$8 sps:$4 sm:$0xff]   ;;  %v3290_v16 = vld [vmem:[#allocation8 + $0x70] ss:$8 sps:$4 sm:$0xff]  }
 0x173   : > { %846 = vmatpush1.bf16.msra.mxu0 %v3272_v4  ;;  %v3294_v17 = vld [vmem:[#allocation7 + $0x4] ss:$8 sps:$4 sm:$0xff]   ;;  %v3292_v19 = vld [vmem:[#allocation7] ss:$8 sps:$4 sm:$0xff]   ;;  %v3299_v20 = vld [vmem:[#allocation7 + $0x14] ss:$8 sps:$4 sm:$0xff]  }
 0x174   : > { %847 = vmatprep.subr.bf16.mxu0 %v3273_v5  ;;  %v3291_v18 = vld [vmem:[%s4229_s5] sm:$0xff]   ;;  %v3297_v21 = vld [vmem:[#allocation7 + $0x10] ss:$8 sps:$4 sm:$0xff]   ;;  %v3295_v23 = vld [vmem:[%s4229_s5 + $0x8] sm:$0xff]   ;;  %s2690_s1 = sshll.u32 %s4218_s2, 8  ;;  %s2797_s14 = sshll.u32 %s3883_s23, 12 }
 0x175   : > { %v3304_v22 = vld [vmem:[#allocation7 + $0x24] ss:$8 sps:$4 sm:$0xff]   ;;  %v3302_v24 = vld [vmem:[#allocation7 + $0x20] ss:$8 sps:$4 sm:$0xff]   ;;  %v3309_v25 = vld [vmem:[#allocation7 + $0x34] ss:$8 sps:$4 sm:$0xff]  }
 0x176   : > { %v3307_v26 = vld [vmem:[#allocation7 + $0x30] ss:$8 sps:$4 sm:$0xff]   ;;  %v3314_v27 = vld [vmem:[#allocation7 + $0x44] ss:$8 sps:$4 sm:$0xff]   ;;  %v3312_v29 = vld [vmem:[#allocation7 + $0x40] ss:$8 sps:$4 sm:$0xff]  }
 0x177   : > { %848 = vmatpush1.bf16.msra.mxu0 %v3275_v6  ;;  %v3319_v30 = vld [vmem:[#allocation7 + $0x54] ss:$8 sps:$4 sm:$0xff]   ;;  %v3317_v31 = vld [vmem:[#allocation7 + $0x50] ss:$8 sps:$4 sm:$0xff]   ;;  %v3324_v32 = vld [vmem:[#allocation7 + $0x64] ss:$8 sps:$4 sm:$0xff]  }
 0x178   : > { %849 = vmatprep.subr.bf16.mxu0 %v3276_v7  ;;  %v3300_v33 = vld [vmem:[%s4229_s5 + $0x18] sm:$0xff]   ;;  %v3322_v34 = vld [vmem:[#allocation7 + $0x60] ss:$8 sps:$4 sm:$0xff]   ;;  %v3306_v39 = vld [vmem:[%s4229_s5 + $0x30] sm:$0xff]   ;;  %s4460_s7 = scalar_lea.vmem [#allocation20], %s2690_s1  ;;  %s4639_s6 = sld [smem:[#allocation39_spill]] }
 0x179   : > { %v3329_v35 = vld [vmem:[#allocation7 + $0x74] ss:$8 sps:$4 sm:$0xff]   ;;  %v3327_v36 = vld [vmem:[#allocation7 + $0x70] ss:$8 sps:$4 sm:$0xff]   ;;  %v3301_v37 = vld [vmem:[%s4229_s5 + $0x20] sm:$0xff]   ;;  %s2479_s22 = sshll.u32 %s4460_s7, 4  ;;  %s4527_s22 = int_to_ptr.vmem [resolvable:$true] %s2479_s22 }
 0x17a   : > { %v3305_v38 = vld [vmem:[%s4229_s5 + $0x28] sm:$0xff]   ;;  %v3310_v40 = vld [vmem:[%s4229_s5 + $0x38] sm:$0xff]   ;;  %v3311_v41 = vld [vmem:[%s4229_s5 + $0x40] sm:$0xff]   ;;  %s2466_s23 = scalar_lea.sflag [#allocation4], %s4218_s2  ;;  %s3691_s26 = scalar_lea.vmem %s4527_s22, 4096 }
 0x17b   : > { %850 = vmatpush1.bf16.msra.mxu0 %v3278_v8  ;;  %v3315_v42 = vld [vmem:[%s4229_s5 + $0x48] sm:$0xff]   ;;  %v3316_v43 = vld [vmem:[%s4229_s5 + $0x50] sm:$0xff]   ;;  %v3320_v44 = vld [vmem:[%s4229_s5 + $0x58] sm:$0xff]   ;;  %p3692_p5 = scmp.ne.s32.totalorder %s4527_s22, %s3691_s26  ;;  %p4640_p9 = scmp.ne.s32.totalorder %s4620_s3, 0 }
 0x17c   : > { %851 = vmatprep.subr.bf16.mxu0 %v3279_v9  ;;  %v3321_v45 = vld [vmem:[%s4229_s5 + $0x60] sm:$0xff]   ;;  %v3325_v46 = vld [vmem:[%s4229_s5 + $0x68] sm:$0xff]   ;;  %v3326_v47 = vld [vmem:[%s4229_s5 + $0x70] sm:$0xff]   ;;  %s3799_s28 = smov [#allocation20]  }
 0x17d   : > { %v3330_v48 = vld [vmem:[%s4229_s5 + $0x78] sm:$0xff]   ;;  %v3347_v49 = vld [vmem:[#allocation11 + $0x40] sm:$0xff]   ;;  %v3349_v51 = vld [vmem:[#allocation11 + $0x48] sm:$0xff]   ;;  %p3693_p4 = pnand %p3692_p5, %p4640_p9  ;;  %s3695_s0 = sshll.u32 %s3799_s28, 4  ;;  %s3696_s0 = int_to_ptr.vmem [resolvable:$false] %s3695_s0 }
 0x17e   : > { %v3348_v50 = vld [vmem:[#allocation11] sm:$0xff]   ;;  %2798 = vmatprep.subr.bf16.mxu1 %v3347_v49  ;;  %v3350_v52 = vld [vmem:[#allocation11 + $0x8] sm:$0xff]   ;;  %v3351_v54 = vld [vmem:[#allocation11 + $0x50] sm:$0xff]   ;;  %s4525_s15 = scalar_lea.hbm %s4639_s6, %s2797_s14  ;;  %s3697_s8 = scalar_lea.vmem %s3696_s0, 8192 }
 0x17f   : > { %852 = vmatpush1.bf16.msra.mxu0 %v3281_v10  ;;  %2799 = vmatpush3.bf16.msra.mxu1 %v3348_v50  ;;  %v3331_v53 = vld [vmem:[%s4222_s11] sm:$0xff]   ;;  %v3352_v55 = vld [vmem:[#allocation11 + $0x10] sm:$0xff]   ;;  %v3332_v58 = vld [vmem:[%s4222_s11 + $0x8] sm:$0xff]   ;;  %p3694_p8 = pneg %p3693_p4  ;;  %p3698_p11 = scmp.lt.s32.totalorder %s4527_s22, %s3696_s0 }
 0x180   : > { %853 = vmatprep.subr.bf16.mxu0 %v3282_v11  ;;  %2800 = vmatprep.subr.bf16.mxu1 %v3349_v51  ;;  %v3353_v56 = vld [vmem:[#allocation11 + $0x58] sm:$0xff]   ;;  %v3355_v59 = vld [vmem:[#allocation11 + $0x60] sm:$0xff]   ;;  %v3357_v61 = vld [vmem:[#allocation11 + $0x68] sm:$0xff]   ;;  %p3699_p3 = scmp.lt.s32.totalorder %s3697_s8, %s3691_s26 }
 0x181   : > { %v3354_v57 = vld [vmem:[#allocation11 + $0x18] sm:$0xff]   ;;  %v3356_v60 = vld [vmem:[#allocation11 + $0x20] sm:$0xff]   ;;  %v3333_v62 = vld [vmem:[%s4222_s11 + $0x10] sm:$0xff]  }
 0x182   : > { %v3334_v63 = vld [vmem:[%s4222_s11 + $0x18] sm:$0xff]   ;;  %v3335_v1 = vld [vmem:[%s4222_s11 + $0x20] sm:$0xff]   ;;  %v3336_v2 = vld [vmem:[%s4222_s11 + $0x28] sm:$0xff]   ;;  %p3700_p12 = por %p3699_p3, %p3698_p11 }
 0x183   : > { %854 = vmatpush1.bf16.msra.mxu0 %v3284_v12  ;;  %2801 = vmatpush3.bf16.msra.mxu1 %v3350_v52  ;;  %v3337_v3 = vld [vmem:[%s4222_s11 + $0x30] sm:$0xff]   ;;  %v3338_v4 = vld [vmem:[%s4222_s11 + $0x38] sm:$0xff]   ;;  %v3339_v5 = vld [vmem:[%s4222_s11 + $0x40] sm:$0xff]  }
 0x184   : > { %855 = vmatprep.subr.bf16.mxu0 %v3285_v13  ;;  %2802 = vmatprep.subr.bf16.mxu1 %v3351_v54  ;;  %v3340_v6 = vld [vmem:[%s4222_s11 + $0x48] sm:$0xff]   ;;  %v3341_v7 = vld [vmem:[%s4222_s11 + $0x50] sm:$0xff]   ;;  %v3342_v9 = vld [vmem:[%s4222_s11 + $0x58] sm:$0xff]   ;;  %p3701_p1 = pnand %p3700_p12, %p3694_p8 }
 0x185   : > { %v3358_v8 = vld [vmem:[#allocation11 + $0x28] sm:$0xff]   ;;  %v3359_v10 = vld [vmem:[#allocation11 + $0x70] sm:$0xff]   ;;  %v3361_v12 = vld [vmem:[#allocation11 + $0x78] sm:$0xff]  }
 0x186   : > { %v3360_v11 = vld [vmem:[#allocation11 + $0x30] sm:$0xff]   ;;  %v3362_v13 = vld [vmem:[#allocation11 + $0x38] sm:$0xff]  }
 0x187   : > { %856 = vmatpush1.bf16.msra.mxu0 %v3287_v14  ;;  %2803 = vmatpush3.bf16.msra.mxu1 %v3352_v55  ;;  %v3343_v14 = vld [vmem:[%s4222_s11 + $0x60] sm:$0xff]   ;;  %v3365_v50 = vld [vmem:[#allocation14 + $0x10] sm:$0xff]  }
 0x188   : > { %857 = vmatprep.subr.bf16.mxu0 %v3288_v15  ;;  %2804 = vmatprep.subr.bf16.mxu1 %v3353_v56  ;;  %v3344_v15 = vld [vmem:[%s4222_s11 + $0x68] sm:$0xff]  }
 0x18b   : > { %858 = vmatpush1.bf16.msra.mxu0 %v3290_v16  ;;  %2805 = vmatpush3.bf16.msra.mxu1 %v3354_v57  ;;  %v3345_v16 = vld [vmem:[%s4222_s11 + $0x70] sm:$0xff]  }
 0x18c   : > { %1212 = vmatprep.subr.bf16.mxu0 %v3294_v17  ;;  %2806 = vmatprep.subr.bf16.mxu1 %v3355_v59  ;;  %v3346_v17 = vld [vmem:[%s4222_s11 + $0x78] sm:$0xff]  }
 0x18e   : > { %876 = vmatmul.mubr.bf16.vlgmr.msra.gmra.mrb[0].mxu0 %v3291_v18  ;;  %v1407_v18 = vlaneseq }
 0x18f   : > { %1213 = vmatpush1.bf16.msra.mxu0 %v3292_v19  ;;  %885 = vmatprep.mubr.bf16.mxu0 %v3798_v0 }
 0x190   : > { %1214 = vmatprep.subr.bf16.mxu0 %v3299_v20  ;;  %2807 = vmatpush3.bf16.msra.mxu1 %v3356_v60  ;;  %v1408_v19 = vshrl.u32 %v1407_v18, 7 }
 0x191   : > { %2808 = vmatprep.subr.bf16.mxu1 %v3357_v61 }
 0x192   : > { %v1409_v20 = vsub.s32 0, %v1408_v19 }
 0x193   : > { %1215 = vmatpush1.bf16.msra.mxu0 %v3297_v21  ;;  %v1405_v21 = vld [vmem:[#allocation10] sm:$0x3] }
 0x194   : > { %1216 = vmatprep.subr.bf16.mxu0 %v3304_v22  ;;  %2809 = vmatpush3.bf16.msra.mxu1 %v3358_v8  ;;  %v1413_v22 = vsub.s32 1, %v1408_v19 }
 0x195   : > { %2810 = vmatprep.subr.bf16.mxu1 %v3359_v10 }
 0x196   : > { %886 = vmatmul.mubr.bf16.gmra.mrb[4].mxu0 %v3295_v23  ;;  %v4319_v23 = vrot.slane %v1405_v21, %v1409_v20 }
 0x197   : > { %895 = vmatprep.mubr.bf16.mxu0 %v3798_v0  ;;  %1217 = vmatpush1.bf16.msra.mxu0 %v3302_v24  ;;  %v4321_v24 = vrot.slane %v1405_v21, %v1413_v22 }
 0x198   : > { %1218 = vmatprep.subr.bf16.mxu0 %v3309_v25  ;;  %2811 = vmatpush3.bf16.msra.mxu1 %v3360_v11 }
 0x199   : > { %2812 = vmatprep.subr.bf16.mxu1 %v3361_v12 }
 0x19b   : > { %1219 = vmatpush1.bf16.msra.mxu0 %v3307_v26 }
 0x19c   : > { %1220 = vmatprep.subr.bf16.mxu0 %v3314_v27  ;;  %2813 = vmatpush3.bf16.msra.mxu1 %v3362_v13 }
 0x19e   : > { %896 = vmatmul.mubr.bf16.gmra.mrb[8].mxu0 %v3296_v28 }
 0x19f   : > { %905 = vmatprep.mubr.bf16.mxu0 %v3798_v0  ;;  %1221 = vmatpush1.bf16.msra.mxu0 %v3312_v29 }
 0x1a0   : > { %1222 = vmatprep.subr.bf16.mxu0 %v3319_v30 }
 0x1a3   : > { %1223 = vmatpush1.bf16.msra.mxu0 %v3317_v31  ;;  %v3363_v31 = vld [vmem:[#allocation14] sm:$0xff]  }
 0x1a4   : > { %1224 = vmatprep.subr.bf16.mxu0 %v3324_v32  ;;  %2958 = vmatprep.subr.bf16.mxu1 %v3363_v31 }
 0x1a6   : > { %906 = vmatmul.mubr.bf16.gmra.mrb[12].mxu0 %v3300_v33 }
 0x1a7   : > { %915 = vmatprep.mubr.bf16.mxu0 %v3798_v0  ;;  %1225 = vmatpush1.bf16.msra.mxu0 %v3322_v34 }
 0x1a8   : > { %1226 = vmatprep.subr.bf16.mxu0 %v3329_v35 }
 0x1ab   : > { %1227 = vmatpush1.bf16.msra.mxu0 %v3327_v36 }
 0x1ae   : > { %916 = vmatmul.mubr.bf16.gmra.mrb[16].mxu0 %v3301_v37 }
 0x1af   : > { %925 = vmatprep.mubr.bf16.mxu0 %v3798_v0 }
 0x1b6   : > { %926 = vmatmul.mubr.bf16.gmra.mrb[20].mxu0 %v3305_v38 }
 0x1b7   : > { %935 = vmatprep.mubr.bf16.mxu0 %v3798_v0 }
 0x1be   : > { %936 = vmatmul.mubr.bf16.gmra.mrb[24].mxu0 %v3306_v39 }
 0x1bf   : > { %945 = vmatprep.mubr.bf16.mxu0 %v3798_v0 }
 0x1c6   : > { %946 = vmatmul.mubr.bf16.gmra.mrb[28].mxu0 %v3310_v40 }
 0x1c7   : > { %955 = vmatprep.mubr.bf16.mxu0 %v3798_v0 }
 0x1ce   : > { %956 = vmatmul.mubr.bf16.gmra.mrb[32].mxu0 %v3311_v41 }
 0x1cf   : > { %965 = vmatprep.mubr.bf16.mxu0 %v3798_v0 }
 0x1d6   : > { %966 = vmatmul.mubr.bf16.gmra.mrb[36].mxu0 %v3315_v42  ;;  %v3364_v42 = vld [vmem:[#allocation14 + $0x8] sm:$0xff]  }
 0x1d7   : > { %975 = vmatprep.mubr.bf16.mxu0 %v3798_v0 }
 0x1de   : > { %976 = vmatmul.mubr.bf16.gmra.mrb[40].mxu0 %v3316_v43 }
 0x1df   : > { %985 = vmatprep.mubr.bf16.mxu0 %v3798_v0 }
 0x1e6   : > { %986 = vmatmul.mubr.bf16.gmra.mrb[44].mxu0 %v3320_v44 }
 0x1e7   : > { %995 = vmatprep.mubr.bf16.mxu0 %v3798_v0 }
 0x1ee   : > { %996 = vmatmul.mubr.bf16.gmra.mrb[48].mxu0 %v3321_v45 }
 0x1ef   : > { %1005 = vmatprep.mubr.bf16.mxu0 %v3798_v0 }
 0x1f6   : > { %1006 = vmatmul.mubr.bf16.gmra.mrb[52].mxu0 %v3325_v46 }
 0x1f7   : > { %1015 = vmatprep.mubr.bf16.mxu0 %v3798_v0 }
 0x1fe   : > { %1016 = vmatmul.mubr.bf16.gmra.mrb[56].mxu0 %v3326_v47 }
 0x1ff   : > { %1025 = vmatprep.mubr.bf16.mxu0 %v3798_v0 }
 0x206   : > { %1026 = vmatmul.mubr.bf16.gmra.mrb[60].mxu0 %v3330_v48 }
 0x207   : > { %1244 = vmatprep.mubr.bf16.mxu0 %v3798_v0 }
 0x20e   : > { %1245 = vmatmul.mubr.bf16.vlgmr.msra.gmra.mrb[0].mxu0 %v3331_v53 }
 0x20f   : > { %1254 = vmatprep.mubr.bf16.mxu0 %v3798_v0 }
 0x216   : > { %1255 = vmatmul.mubr.bf16.gmra.mrb[4].mxu0 %v3332_v58  ;;  %v3366_v58 = vld [vmem:[#allocation14 + $0x18] sm:$0xff]  }
 0x217   : > { %1264 = vmatprep.mubr.bf16.mxu0 %v3798_v0 }
 0x21e   : > { %1265 = vmatmul.mubr.bf16.gmra.mrb[8].mxu0 %v3333_v62 }
 0x21f   : > { %1274 = vmatprep.mubr.bf16.mxu0 %v3798_v0 }
 0x226   : > { %1275 = vmatmul.mubr.bf16.gmra.mrb[12].mxu0 %v3334_v63 }
 0x227   : > { %1284 = vmatprep.mubr.bf16.mxu0 %v3798_v0 }
 0x22e   : > { %1285 = vmatmul.mubr.bf16.gmra.mrb[16].mxu0 %v3335_v1 }
 0x22f   : > { %1294 = vmatprep.mubr.bf16.mxu0 %v3798_v0 }
 0x236   : > { %1295 = vmatmul.mubr.bf16.gmra.mrb[20].mxu0 %v3336_v2 }
 0x237   : > { %1304 = vmatprep.mubr.bf16.mxu0 %v3798_v0 }
 0x23e   : > { %1305 = vmatmul.mubr.bf16.gmra.mrb[24].mxu0 %v3337_v3 }
 0x23f   : > { %1314 = vmatprep.mubr.bf16.mxu0 %v3798_v0 }
 0x246   : > { %1315 = vmatmul.mubr.bf16.gmra.mrb[28].mxu0 %v3338_v4 }
 0x247   : > { %1324 = vmatprep.mubr.bf16.mxu0 %v3798_v0 }
 0x24e   : > { %1325 = vmatmul.mubr.bf16.gmra.mrb[32].mxu0 %v3339_v5 }
 0x24f   : > { %1334 = vmatprep.mubr.bf16.mxu0 %v3798_v0 }
 0x256   : > { %1335 = vmatmul.mubr.bf16.gmra.mrb[36].mxu0 %v3340_v6 }
 0x257   : > { %1344 = vmatprep.mubr.bf16.mxu0 %v3798_v0 }
 0x25e   : > { %1345 = vmatmul.mubr.bf16.gmra.mrb[40].mxu0 %v3341_v7 }
 0x25f   : > { %1354 = vmatprep.mubr.bf16.mxu0 %v3798_v0 }
 0x266   : > { %1355 = vmatmul.mubr.bf16.gmra.mrb[44].mxu0 %v3342_v9 }
 0x267   : > { %1364 = vmatprep.mubr.bf16.mxu0 %v3798_v0 }
 0x26e   : > { %1365 = vmatmul.mubr.bf16.gmra.mrb[48].mxu0 %v3343_v14 }
 0x26f   : > { %1374 = vmatprep.mubr.bf16.mxu0 %v3798_v0 }
 0x276   : > { %1375 = vmatmul.mubr.bf16.gmra.mrb[52].mxu0 %v3344_v15 }
 0x277   : > { %1384 = vmatprep.mubr.bf16.mxu0 %v3798_v0 }
 0x27e   : > { %1385 = vmatmul.mubr.bf16.gmra.mrb[56].mxu0 %v3345_v16 }
 0x27f   : > { %1394 = vmatprep.mubr.bf16.mxu0 %v3798_v0 }
 0x286   : > { %1395 = vmatmul.mubr.bf16.gmra.mrb[60].mxu0 %v3346_v17 }
 0x2e1   : > { %v1246_v25 = vpop.f32.mrb[0].mxu0 }
 0x2e2   : > { %v1417_v26 = vadd.f32 %v4319_v23, %v1246_v25  ;;  %v1248_v27 = vpop.f32.mrb[1].mxu0 }
 0x2e3   : > { %v1418_v28 = vadd.f32 %v4321_v24, %v1248_v27  ;;  %v1250_v29 = vpop.f32.mrb[2].mxu0 }
 0x2e4   : > { %v1419_v0 = vadd.f32 %v4319_v23, %v1250_v29  ;;  %v1252_v30 = vpop.f32.mrb[3].mxu0  ;;  %v1481_v33 = vmax.f32 %v1417_v26, 0.0 }
 0x2e5   : > { %v1420_v32 = vadd.f32 %v4321_v24, %v1252_v30  ;;  %v1482_v35 = vmax.f32 %v1418_v28, 0.0 }
 0x2e6   : > { %v1483_v34 = vmax.f32 %v1419_v0, 0.0 }
 0x2e7   : > { %v1484_v36 = vmax.f32 %v1420_v32, 0.0 }
 0x2e8   : > { %v1545_v37 = vpack.c.bf16 %v1483_v34, %v1481_v33 }
 0x2e9   : > { %v1256_v38 = vpop.f32.mrb[4].mxu0  ;;  %v1546_v39 = vpack.c.bf16 %v1484_v36, %v1482_v35 }
 0x2ea   : > { %v1421_v40 = vadd.f32 %v4319_v23, %v1256_v38  ;;  %v1258_v41 = vpop.f32.mrb[5].mxu0 }
 0x2eb   : > { %v1422_v43 = vadd.f32 %v4321_v24, %v1258_v41  ;;  %v1260_v44 = vpop.f32.mrb[6].mxu0  ;;  %1744 = vmatprep.mubr.bf16.mxu1 %v1546_v39 }
 0x2ec   : > { %v1423_v45 = vadd.f32 %v4319_v23, %v1260_v44  ;;  %v1262_v46 = vpop.f32.mrb[7].mxu0  ;;  %1745 = vmatmul.mubr.bf16.vlgmr.msra.gmra.mrb[0].mxu1 %v1545_v37  ;;  %v1485_v48 = vmax.f32 %v1421_v40, 0.0 }
 0x2ed   : > { %v1424_v47 = vadd.f32 %v4321_v24, %v1262_v46  ;;  %2959 = vmatpush3.bf16.msra.mxu1 %v3363_v31  ;;  %v1486_v51 = vmax.f32 %v1422_v43, 0.0 }
 0x2ee   : > { %v1487_v49 = vmax.f32 %v1423_v45, 0.0  ;;  %2960 = vmatprep.subr.bf16.mxu1 %v3364_v42 }
 0x2ef   : > { %v1488_v52 = vmax.f32 %v1424_v47, 0.0 }
 0x2f0   : > { %v1547_v53 = vpack.c.bf16 %v1487_v49, %v1485_v48 }
 0x2f1   : > { %v1548_v54 = vpack.c.bf16 %v1488_v52, %v1486_v51  ;;  %v1266_v55 = vpop.f32.mrb[8].mxu0  ;;  %2961 = vmatpush3.bf16.msra.mxu1 %v3364_v42 }
 0x2f2   : > { %v1425_v56 = vadd.f32 %v4319_v23, %v1266_v55  ;;  %v1268_v57 = vpop.f32.mrb[9].mxu0  ;;  %2962 = vmatprep.subr.bf16.mxu1 %v3365_v50 }
 0x2f3   : > { %v1426_v59 = vadd.f32 %v4321_v24, %v1268_v57  ;;  %v1270_v60 = vpop.f32.mrb[10].mxu0  ;;  %1752 = vmatprep.mubr.bf16.mxu1 %v1548_v54 }
 0x2f4   : > { %v1427_v61 = vadd.f32 %v4319_v23, %v1270_v60  ;;  %v1272_v62 = vpop.f32.mrb[11].mxu0  ;;  %1753 = vmatmul.mubr.bf16.gmra.mrb[4].mxu1 %v1547_v53  ;;  %v1489_v1 = vmax.f32 %v1425_v56, 0.0 }
 0x2f5   : > { %v1428_v63 = vadd.f32 %v4321_v24, %v1272_v62  ;;  %2963 = vmatpush3.bf16.msra.mxu1 %v3365_v50  ;;  %v1490_v3 = vmax.f32 %v1426_v59, 0.0 }
 0x2f6   : > { %v1491_v2 = vmax.f32 %v1427_v61, 0.0  ;;  %2964 = vmatprep.subr.bf16.mxu1 %v3366_v58 }
 0x2f7   : > { %v1492_v4 = vmax.f32 %v1428_v63, 0.0 }
 0x2f8   : > { %v1549_v5 = vpack.c.bf16 %v1491_v2, %v1489_v1 }
 0x2f9   : > { %v1550_v6 = vpack.c.bf16 %v1492_v4, %v1490_v3  ;;  %v1276_v7 = vpop.f32.mrb[12].mxu0  ;;  %2965 = vmatpush3.bf16.msra.mxu1 %v3366_v58 }
 0x2fa   : > { %v1429_v8 = vadd.f32 %v4319_v23, %v1276_v7  ;;  %v1278_v9 = vpop.f32.mrb[13].mxu0 }
 0x2fb   : > { %v1430_v10 = vadd.f32 %v4321_v24, %v1278_v9  ;;  %v1280_v11 = vpop.f32.mrb[14].mxu0  ;;  %1760 = vmatprep.mubr.bf16.mxu1 %v1550_v6 }
 0x2fc   : > { %v1431_v12 = vadd.f32 %v4319_v23, %v1280_v11  ;;  %v1282_v13 = vpop.f32.mrb[15].mxu0  ;;  %1761 = vmatmul.mubr.bf16.gmra.mrb[8].mxu1 %v1549_v5  ;;  %v1493_v15 = vmax.f32 %v1429_v8, 0.0 }
 0x2fd   : > { %v1432_v14 = vadd.f32 %v4321_v24, %v1282_v13  ;;  %v1494_v17 = vmax.f32 %v1430_v10, 0.0 }
 0x2fe   : > { %v1495_v16 = vmax.f32 %v1431_v12, 0.0 }
 0x2ff   : > { %v1496_v18 = vmax.f32 %v1432_v14, 0.0 }
 0x300   : > { %v1551_v19 = vpack.c.bf16 %v1495_v16, %v1493_v15 }
 0x301   : > { %v1552_v20 = vpack.c.bf16 %v1496_v18, %v1494_v17  ;;  %v1286_v21 = vpop.f32.mrb[16].mxu0 }
 0x302   : > { %v1433_v22 = vadd.f32 %v4319_v23, %v1286_v21  ;;  %v1288_v25 = vpop.f32.mrb[17].mxu0 }
 0x303   : > { %v1434_v26 = vadd.f32 %v4321_v24, %v1288_v25  ;;  %v1290_v27 = vpop.f32.mrb[18].mxu0  ;;  %1768 = vmatprep.mubr.bf16.mxu1 %v1552_v20 }
 0x304   : > { %v1435_v28 = vadd.f32 %v4319_v23, %v1290_v27  ;;  %v1292_v29 = vpop.f32.mrb[19].mxu0  ;;  %1769 = vmatmul.mubr.bf16.gmra.mrb[12].mxu1 %v1551_v19  ;;  %v1497_v30 = vmax.f32 %v1433_v22, 0.0 }
 0x305   : > { %v1436_v0 = vadd.f32 %v4321_v24, %v1292_v29  ;;  %v1498_v32 = vmax.f32 %v1434_v26, 0.0 }
 0x306   : > { %v1499_v31 = vmax.f32 %v1435_v28, 0.0 }
 0x307   : > { %v1500_v33 = vmax.f32 %v1436_v0, 0.0 }
 0x308   : > { %v1553_v34 = vpack.c.bf16 %v1499_v31, %v1497_v30 }
 0x309   : > { %v1554_v35 = vpack.c.bf16 %v1500_v33, %v1498_v32  ;;  %v1296_v36 = vpop.f32.mrb[20].mxu0 }
 0x30a   : > { %v1437_v37 = vadd.f32 %v4319_v23, %v1296_v36  ;;  %v1298_v38 = vpop.f32.mrb[21].mxu0 }
 0x30b   : > { %v1438_v39 = vadd.f32 %v4321_v24, %v1298_v38  ;;  %v1300_v40 = vpop.f32.mrb[22].mxu0  ;;  %1776 = vmatprep.mubr.bf16.mxu1 %v1554_v35 }
 0x30c   : > { %v1439_v41 = vadd.f32 %v4319_v23, %v1300_v40  ;;  %v1302_v42 = vpop.f32.mrb[23].mxu0  ;;  %1777 = vmatmul.mubr.bf16.gmra.mrb[16].mxu1 %v1553_v34  ;;  %v1501_v44 = vmax.f32 %v1437_v37, 0.0 }
 0x30d   : > { %v1440_v43 = vadd.f32 %v4321_v24, %v1302_v42  ;;  %v1502_v46 = vmax.f32 %v1438_v39, 0.0 }
 0x30e   : > { %v1503_v45 = vmax.f32 %v1439_v41, 0.0 }
 0x30f   : > { %v1504_v47 = vmax.f32 %v1440_v43, 0.0 }
 0x310   : > { %v1555_v48 = vpack.c.bf16 %v1503_v45, %v1501_v44 }
 0x311   : > { %v1556_v49 = vpack.c.bf16 %v1504_v47, %v1502_v46  ;;  %v1306_v50 = vpop.f32.mrb[24].mxu0 }
 0x312   : > { %v1441_v51 = vadd.f32 %v4319_v23, %v1306_v50  ;;  %v1308_v52 = vpop.f32.mrb[25].mxu0 }
 0x313   : > { %v1442_v53 = vadd.f32 %v4321_v24, %v1308_v52  ;;  %v1310_v54 = vpop.f32.mrb[26].mxu0  ;;  %1784 = vmatprep.mubr.bf16.mxu1 %v1556_v49 }
 0x314   : > { %v1443_v55 = vadd.f32 %v4319_v23, %v1310_v54  ;;  %v1312_v56 = vpop.f32.mrb[27].mxu0  ;;  %1785 = vmatmul.mubr.bf16.gmra.mrb[20].mxu1 %v1555_v48  ;;  %v1505_v58 = vmax.f32 %v1441_v51, 0.0 }
 0x315   : > { %v1444_v57 = vadd.f32 %v4321_v24, %v1312_v56  ;;  %v1506_v60 = vmax.f32 %v1442_v53, 0.0 }
 0x316   : > { %v1507_v59 = vmax.f32 %v1443_v55, 0.0 }
 0x317   : > { %v1508_v61 = vmax.f32 %v1444_v57, 0.0 }
 0x318   : > { %v1557_v62 = vpack.c.bf16 %v1507_v59, %v1505_v58 }
 0x319   : > { %v1558_v63 = vpack.c.bf16 %v1508_v61, %v1506_v60  ;;  %v1316_v1 = vpop.f32.mrb[28].mxu0 }
 0x31a   : > { %v1445_v2 = vadd.f32 %v4319_v23, %v1316_v1  ;;  %v1318_v3 = vpop.f32.mrb[29].mxu0 }
 0x31b   : > { %v1446_v4 = vadd.f32 %v4321_v24, %v1318_v3  ;;  %v1320_v5 = vpop.f32.mrb[30].mxu0  ;;  %1792 = vmatprep.mubr.bf16.mxu1 %v1558_v63 }
 0x31c   : > { %v1447_v6 = vadd.f32 %v4319_v23, %v1320_v5  ;;  %v1322_v7 = vpop.f32.mrb[31].mxu0  ;;  %1793 = vmatmul.mubr.bf16.gmra.mrb[24].mxu1 %v1557_v62  ;;  %v1509_v9 = vmax.f32 %v1445_v2, 0.0 }
 0x31d   : > { %v1448_v8 = vadd.f32 %v4321_v24, %v1322_v7  ;;  %v1510_v11 = vmax.f32 %v1446_v4, 0.0 }
 0x31e   : > { %v1511_v10 = vmax.f32 %v1447_v6, 0.0 }
 0x31f   : > { %v1512_v12 = vmax.f32 %v1448_v8, 0.0 }
 0x320   : > { %v1559_v13 = vpack.c.bf16 %v1511_v10, %v1509_v9  ;;  %v3367_v10 = vld [vmem:[#allocation14 + $0x20] sm:$0xff]  }
 0x321   : > { %v1560_v14 = vpack.c.bf16 %v1512_v12, %v1510_v11  ;;  %v1326_v15 = vpop.f32.mrb[32].mxu0  ;;  %2966 = vmatprep.subr.bf16.mxu1 %v3367_v10 }
 0x322   : > { %v1449_v16 = vadd.f32 %v4319_v23, %v1326_v15  ;;  %v1328_v17 = vpop.f32.mrb[33].mxu0  ;;  %2967 = vmatpush3.bf16.msra.mxu1 %v3367_v10 }
 0x323   : > { %v1450_v18 = vadd.f32 %v4321_v24, %v1328_v17  ;;  %v1330_v19 = vpop.f32.mrb[34].mxu0  ;;  %1800 = vmatprep.mubr.bf16.mxu1 %v1560_v14 }
 0x324   : > { %v1451_v20 = vadd.f32 %v4319_v23, %v1330_v19  ;;  %v1332_v21 = vpop.f32.mrb[35].mxu0  ;;  %1801 = vmatmul.mubr.bf16.gmra.mrb[28].mxu1 %v1559_v13  ;;  %v1513_v25 = vmax.f32 %v1449_v16, 0.0 }
 0x325   : > { %v1452_v22 = vadd.f32 %v4321_v24, %v1332_v21  ;;  %v1514_v27 = vmax.f32 %v1450_v18, 0.0  ;;  %v3368_v18 = vld [vmem:[#allocation14 + $0x28] sm:$0xff]  }
 0x326   : > { %v1515_v26 = vmax.f32 %v1451_v20, 0.0  ;;  %2968 = vmatprep.subr.bf16.mxu1 %v3368_v18 }
 0x327   : > { %v1516_v28 = vmax.f32 %v1452_v22, 0.0  ;;  %2969 = vmatpush3.bf16.msra.mxu1 %v3368_v18 }
 0x328   : > { %v1561_v29 = vpack.c.bf16 %v1515_v26, %v1513_v25 }
 0x329   : > { %v1562_v0 = vpack.c.bf16 %v1516_v28, %v1514_v27  ;;  %v1336_v30 = vpop.f32.mrb[36].mxu0  ;;  %v3369_v28 = vld [vmem:[#allocation14 + $0x30] sm:$0xff]  }
 0x32a   : > { %v1453_v31 = vadd.f32 %v4319_v23, %v1336_v30  ;;  %v1338_v32 = vpop.f32.mrb[37].mxu0  ;;  %2970 = vmatprep.subr.bf16.mxu1 %v3369_v28 }
 0x32b   : > { %v1454_v33 = vadd.f32 %v4321_v24, %v1338_v32  ;;  %v1340_v34 = vpop.f32.mrb[38].mxu0  ;;  %1808 = vmatprep.mubr.bf16.mxu1 %v1562_v0  ;;  %2971 = vmatpush3.bf16.msra.mxu1 %v3369_v28 }
 0x32c   : > { %v1455_v35 = vadd.f32 %v4319_v23, %v1340_v34  ;;  %v1342_v36 = vpop.f32.mrb[39].mxu0  ;;  %1809 = vmatmul.mubr.bf16.gmra.mrb[32].mxu1 %v1561_v29  ;;  %v1517_v38 = vmax.f32 %v1453_v31, 0.0 }
 0x32d   : > { %v1456_v37 = vadd.f32 %v4321_v24, %v1342_v36  ;;  %v1518_v40 = vmax.f32 %v1454_v33, 0.0 }
 0x32e   : > { %v1519_v39 = vmax.f32 %v1455_v35, 0.0  ;;  %v3370_v35 = vld [vmem:[#allocation14 + $0x38] sm:$0xff]  }
 0x32f   : > { %v1520_v41 = vmax.f32 %v1456_v37, 0.0  ;;  %2972 = vmatprep.subr.bf16.mxu1 %v3370_v35 }
 0x330   : > { %v1563_v42 = vpack.c.bf16 %v1519_v39, %v1517_v38  ;;  %2973 = vmatpush3.bf16.msra.mxu1 %v3370_v35 }
 0x331   : > { %v1564_v43 = vpack.c.bf16 %v1520_v41, %v1518_v40  ;;  %v1346_v44 = vpop.f32.mrb[40].mxu0 }
 0x332   : > { %v1457_v45 = vadd.f32 %v4319_v23, %v1346_v44  ;;  %v1348_v46 = vpop.f32.mrb[41].mxu0 }
 0x333   : > { %v1458_v47 = vadd.f32 %v4321_v24, %v1348_v46  ;;  %v1350_v48 = vpop.f32.mrb[42].mxu0  ;;  %1816 = vmatprep.mubr.bf16.mxu1 %v1564_v43 }
 0x334   : > { %v1459_v49 = vadd.f32 %v4319_v23, %v1350_v48  ;;  %v1352_v50 = vpop.f32.mrb[43].mxu0  ;;  %1817 = vmatmul.mubr.bf16.gmra.mrb[36].mxu1 %v1563_v42  ;;  %v1521_v52 = vmax.f32 %v1457_v45, 0.0 }
 0x335   : > { %v1460_v51 = vadd.f32 %v4321_v24, %v1352_v50  ;;  %v1522_v54 = vmax.f32 %v1458_v47, 0.0 }
 0x336   : > { %v1523_v53 = vmax.f32 %v1459_v49, 0.0 }
 0x337   : > { %v1524_v55 = vmax.f32 %v1460_v51, 0.0 }
 0x338   : > { %v1565_v56 = vpack.c.bf16 %v1523_v53, %v1521_v52 }
 0x339   : > { %v1566_v57 = vpack.c.bf16 %v1524_v55, %v1522_v54  ;;  %v1356_v58 = vpop.f32.mrb[44].mxu0 }
 0x33a   : > { %v1461_v59 = vadd.f32 %v4319_v23, %v1356_v58  ;;  %v1358_v60 = vpop.f32.mrb[45].mxu0 }
 0x33b   : > { %v1462_v61 = vadd.f32 %v4321_v24, %v1358_v60  ;;  %v1360_v62 = vpop.f32.mrb[46].mxu0  ;;  %1824 = vmatprep.mubr.bf16.mxu1 %v1566_v57 }
 0x33c   : > { %v1463_v63 = vadd.f32 %v4319_v23, %v1360_v62  ;;  %v1362_v1 = vpop.f32.mrb[47].mxu0  ;;  %1825 = vmatmul.mubr.bf16.gmra.mrb[40].mxu1 %v1565_v56  ;;  %v1525_v3 = vmax.f32 %v1461_v59, 0.0 }
 0x33d   : > { %v1464_v2 = vadd.f32 %v4321_v24, %v1362_v1  ;;  %v1526_v5 = vmax.f32 %v1462_v61, 0.0 }
 0x33e   : > { %v1527_v4 = vmax.f32 %v1463_v63, 0.0 }
 0x33f   : > { %v1528_v6 = vmax.f32 %v1464_v2, 0.0 }
 0x340   : > { %v1567_v7 = vpack.c.bf16 %v1527_v4, %v1525_v3 }
 0x341   : > { %v1568_v8 = vpack.c.bf16 %v1528_v6, %v1526_v5  ;;  %v1366_v9 = vpop.f32.mrb[48].mxu0 }
 0x342   : > { %v1465_v11 = vadd.f32 %v4319_v23, %v1366_v9  ;;  %v1368_v12 = vpop.f32.mrb[49].mxu0 }
 0x343   : > { %v1466_v13 = vadd.f32 %v4321_v24, %v1368_v12  ;;  %v1370_v14 = vpop.f32.mrb[50].mxu0  ;;  %1832 = vmatprep.mubr.bf16.mxu1 %v1568_v8  ;;  %v4387_v8 = vld [vmem:[#allocation13] ss:$0 sm:$0xff] }
 0x344   : > { %v1467_v15 = vadd.f32 %v4319_v23, %v1370_v14  ;;  %v1372_v16 = vpop.f32.mrb[51].mxu0  ;;  %1833 = vmatmul.mubr.bf16.gmra.mrb[44].mxu1 %v1567_v7  ;;  %v1529_v19 = vmax.f32 %v1465_v11, 0.0  ;;  %v3371_v14 = vld [vmem:[#allocation17] sm:$0xff]  }
 0x345   : > { %v1468_v17 = vadd.f32 %v4321_v24, %v1372_v16  ;;  %v1530_v21 = vmax.f32 %v1466_v13, 0.0  ;;  %3006 = vmatprep.subr.bf16.mxu1 %v3371_v14 }
 0x346   : > { %v1531_v20 = vmax.f32 %v1467_v15, 0.0 }
 0x347   : > { %v1532_v22 = vmax.f32 %v1468_v17, 0.0 }
 0x348   : > { %v1569_v25 = vpack.c.bf16 %v1531_v20, %v1529_v19 }
 0x349   : > { %v1570_v26 = vpack.c.bf16 %v1532_v22, %v1530_v21  ;;  %v1376_v27 = vpop.f32.mrb[52].mxu0 }
 0x34a   : > { %v1469_v29 = vadd.f32 %v4319_v23, %v1376_v27  ;;  %v1378_v0 = vpop.f32.mrb[53].mxu0 }
 0x34b   : > { %v1470_v30 = vadd.f32 %v4321_v24, %v1378_v0  ;;  %v1380_v31 = vpop.f32.mrb[54].mxu0  ;;  %1840 = vmatprep.mubr.bf16.mxu1 %v1570_v26 }
 0x34c   : > { %v1471_v32 = vadd.f32 %v4319_v23, %v1380_v31  ;;  %v1382_v33 = vpop.f32.mrb[55].mxu0  ;;  %1841 = vmatmul.mubr.bf16.gmra.mrb[48].mxu1 %v1569_v25  ;;  %v1533_v36 = vmax.f32 %v1469_v29, 0.0 }
 0x34d   : > { %v1472_v34 = vadd.f32 %v4321_v24, %v1382_v33  ;;  %v1534_v38 = vmax.f32 %v1470_v30, 0.0 }
 0x34e   : > { %v1535_v37 = vmax.f32 %v1471_v32, 0.0 }
 0x34f   : > { %v1536_v39 = vmax.f32 %v1472_v34, 0.0  ;;  %v3372_v34 = vld [vmem:[#allocation17 + $0x8] sm:$0xff]  }
 0x350   : > { %v1571_v40 = vpack.c.bf16 %v1535_v37, %v1533_v36 }
 0x351   : > { %v1572_v41 = vpack.c.bf16 %v1536_v39, %v1534_v38  ;;  %v1386_v42 = vpop.f32.mrb[56].mxu0  ;;  %v3373_v39 = vld [vmem:[#allocation17 + $0x10] sm:$0xff]  }
 0x352   : > { %v1473_v43 = vadd.f32 %v4319_v23, %v1386_v42  ;;  %v1388_v44 = vpop.f32.mrb[57].mxu0 }
 0x353   : > { %v1474_v45 = vadd.f32 %v4321_v24, %v1388_v44  ;;  %v1390_v46 = vpop.f32.mrb[58].mxu0  ;;  %1848 = vmatprep.mubr.bf16.mxu1 %v1572_v41 }
 0x354   : > { %v1475_v47 = vadd.f32 %v4319_v23, %v1390_v46  ;;  %v1392_v48 = vpop.f32.mrb[59].mxu0  ;;  %1849 = vmatmul.mubr.bf16.gmra.mrb[52].mxu1 %v1571_v40  ;;  %v1537_v50 = vmax.f32 %v1473_v43, 0.0 }
 0x355   : > { %v1476_v49 = vadd.f32 %v4321_v24, %v1392_v48  ;;  %v1538_v52 = vmax.f32 %v1474_v45, 0.0 }
 0x356   : > { %v1539_v51 = vmax.f32 %v1475_v47, 0.0  ;;  %v3374_v47 = vld [vmem:[#allocation17 + $0x18] sm:$0xff]  }
 0x357   : > { %v1540_v53 = vmax.f32 %v1476_v49, 0.0 }
 0x358   : > { %v1573_v54 = vpack.c.bf16 %v1539_v51, %v1537_v50 }
 0x359   : > { %v1574_v55 = vpack.c.bf16 %v1540_v53, %v1538_v52  ;;  %v1396_v56 = vpop.f32.mrb[60].mxu0  ;;  %v3375_v52 = vld [vmem:[#allocation17 + $0x20] sm:$0xff]  }
 0x35a   : > { %v1477_v57 = vadd.f32 %v4319_v23, %v1396_v56  ;;  %v1398_v58 = vpop.f32.mrb[61].mxu0 }
 0x35b   : > { %v1478_v59 = vadd.f32 %v4321_v24, %v1398_v58  ;;  %v1400_v60 = vpop.f32.mrb[62].mxu0  ;;  %1856 = vmatprep.mubr.bf16.mxu1 %v1574_v55 }
 0x35c   : > { %v1479_v61 = vadd.f32 %v4319_v23, %v1400_v60  ;;  %v1402_v62 = vpop.f32.mrb[63].mxu0  ;;  %1857 = vmatmul.mubr.bf16.gmra.mrb[56].mxu1 %v1573_v54  ;;  %v1541_v1 = vmax.f32 %v1477_v57, 0.0  ;;  %v3376_v60 = vld [vmem:[#allocation17 + $0x28] sm:$0xff]  }
 0x35d   : > { %v1480_v63 = vadd.f32 %v4321_v24, %v1402_v62  ;;  %v1542_v3 = vmax.f32 %v1478_v59, 0.0 }
 0x35e   : > { %v1543_v2 = vmax.f32 %v1479_v61, 0.0 }
 0x35f   : > { %v1544_v4 = vmax.f32 %v1480_v63, 0.0 }
 0x360   : > { %v1575_v5 = vpack.c.bf16 %v1543_v2, %v1541_v1 }
 0x361   : > { %v1576_v6 = vpack.c.bf16 %v1544_v4, %v1542_v3 }
 0x363   : > { %1864 = vmatprep.mubr.bf16.mxu1 %v1576_v6 }
 0x364   : > { %1865 = vmatmul.mubr.bf16.gmra.mrb[60].mxu1 %v1575_v5 }
 0x3bf   : > { %v2814_v7 = vpop.f32.mrb[0].mxu1 }
 0x3c0   : > { %v2815_v9 = vpop.f32.mrb[1].mxu1 }
 0x3c1   : > { %v2816_v10 = vadd.f32 %v2815_v9, %v2814_v7  ;;  %v2817_v11 = vpop.f32.mrb[2].mxu1 }
 0x3c2   : > { %v2818_v12 = vpop.f32.mrb[3].mxu1 }
 0x3c3   : > { %v1747_v23 = vadd.f32 %v2816_v10, %v4387_v8  ;;  %v2819_v13 = vadd.f32 %v2818_v12, %v2817_v11 }
 0x3c5   : > { %v1750_v24 = vadd.f32 %v2819_v13, %v4387_v8  ;;  %v1873_v15 = vmax.f32 %v1747_v23, 0.0 }
 0x3c7   : > { %v1874_v16 = vmax.f32 %v1750_v24, 0.0  ;;  %v2820_v17 = vpop.f32.mrb[4].mxu1 }
 0x3c8   : > { %v2821_v18 = vpop.f32.mrb[5].mxu1 }
 0x3c9   : > { %v2822_v19 = vadd.f32 %v2821_v18, %v2820_v17  ;;  %v2823_v20 = vpop.f32.mrb[6].mxu1  ;;  %v1905_v21 = vpack.c.bf16 %v1874_v16, %v1873_v15 }
 0x3ca   : > { %v2824_v22 = vpop.f32.mrb[7].mxu1 }
 0x3cb   : > { %v1755_v25 = vadd.f32 %v2822_v19, %v4387_v8  ;;  %v2825_v26 = vadd.f32 %v2824_v22, %v2823_v20  ;;  %2974 = vmatprep.mubr.bf16.mxu1 %v1905_v21 }
 0x3cd   : > { %v1758_v27 = vadd.f32 %v2825_v26, %v4387_v8  ;;  %v1875_v28 = vmax.f32 %v1755_v25, 0.0 }
 0x3cf   : > { %v1876_v29 = vmax.f32 %v1758_v27, 0.0  ;;  %v2826_v0 = vpop.f32.mrb[8].mxu1 }
 0x3d0   : > { %v2827_v30 = vpop.f32.mrb[9].mxu1 }
 0x3d1   : > { %v1906_v31 = vpack.c.bf16 %v1876_v29, %v1875_v28  ;;  %v2828_v32 = vadd.f32 %v2827_v30, %v2826_v0  ;;  %v2829_v33 = vpop.f32.mrb[10].mxu1 }
 0x3d2   : > { %v2830_v35 = vpop.f32.mrb[11].mxu1 }
 0x3d3   : > { %v1763_v36 = vadd.f32 %v2828_v32, %v4387_v8  ;;  %v2831_v37 = vadd.f32 %v2830_v35, %v2829_v33  ;;  %2975 = vmatmul.mubr.bf16.vlgmr.msra.gmra.mrb[64].mxu1 %v1906_v31 }
 0x3d4   : > { %3007 = vmatpush3.bf16.msra.mxu1 %v3371_v14 }
 0x3d5   : > { %v1766_v38 = vadd.f32 %v2831_v37, %v4387_v8  ;;  %3008 = vmatprep.subr.bf16.mxu1 %v3372_v34  ;;  %v1877_v40 = vmax.f32 %v1763_v36, 0.0 }
 0x3d7   : > { %v1878_v41 = vmax.f32 %v1766_v38, 0.0  ;;  %v2832_v42 = vpop.f32.mrb[12].mxu1 }
 0x3d8   : > { %v2833_v43 = vpop.f32.mrb[13].mxu1  ;;  %3009 = vmatpush3.bf16.msra.mxu1 %v3372_v34 }
 0x3d9   : > { %v2834_v44 = vadd.f32 %v2833_v43, %v2832_v42  ;;  %v2835_v45 = vpop.f32.mrb[14].mxu1  ;;  %v1907_v46 = vpack.c.bf16 %v1878_v41, %v1877_v40  ;;  %3010 = vmatprep.subr.bf16.mxu1 %v3373_v39 }
 0x3da   : > { %v2836_v48 = vpop.f32.mrb[15].mxu1 }
 0x3db   : > { %v1771_v49 = vadd.f32 %v2834_v44, %v4387_v8  ;;  %v2837_v50 = vadd.f32 %v2836_v48, %v2835_v45  ;;  %2978 = vmatprep.mubr.bf16.mxu1 %v1907_v46 }
 0x3dc   : > { %3011 = vmatpush3.bf16.msra.mxu1 %v3373_v39 }
 0x3dd   : > { %v1774_v51 = vadd.f32 %v2837_v50, %v4387_v8  ;;  %3012 = vmatprep.subr.bf16.mxu1 %v3374_v47  ;;  %v1879_v53 = vmax.f32 %v1771_v49, 0.0 }
 0x3df   : > { %v1880_v54 = vmax.f32 %v1774_v51, 0.0  ;;  %v2838_v55 = vpop.f32.mrb[16].mxu1 }
 0x3e0   : > { %v2839_v56 = vpop.f32.mrb[17].mxu1  ;;  %3013 = vmatpush3.bf16.msra.mxu1 %v3374_v47 }
 0x3e1   : > { %v2840_v57 = vadd.f32 %v2839_v56, %v2838_v55  ;;  %v2841_v58 = vpop.f32.mrb[18].mxu1  ;;  %v1908_v59 = vpack.c.bf16 %v1880_v54, %v1879_v53  ;;  %3014 = vmatprep.subr.bf16.mxu1 %v3375_v52 }
 0x3e2   : > { %v2842_v61 = vpop.f32.mrb[19].mxu1 }
 0x3e3   : > { %v1779_v62 = vadd.f32 %v2840_v57, %v4387_v8  ;;  %v2843_v63 = vadd.f32 %v2842_v61, %v2841_v58  ;;  %2979 = vmatmul.mubr.bf16.gmra.mrb[68].mxu1 %v1908_v59 }
 0x3e4   : > { %3015 = vmatpush3.bf16.msra.mxu1 %v3375_v52 }
 0x3e5   : > { %v1782_v1 = vadd.f32 %v2843_v63, %v4387_v8  ;;  %3016 = vmatprep.subr.bf16.mxu1 %v3376_v60  ;;  %v1881_v2 = vmax.f32 %v1779_v62, 0.0 }
 0x3e7   : > { %v1882_v3 = vmax.f32 %v1782_v1, 0.0  ;;  %v2844_v4 = vpop.f32.mrb[20].mxu1 }
 0x3e8   : > { %v2845_v5 = vpop.f32.mrb[21].mxu1  ;;  %3017 = vmatpush3.bf16.msra.mxu1 %v3376_v60 }
 0x3e9   : > { %v2846_v6 = vadd.f32 %v2845_v5, %v2844_v4  ;;  %v2847_v7 = vpop.f32.mrb[22].mxu1  ;;  %v1909_v9 = vpack.c.bf16 %v1882_v3, %v1881_v2 }
 0x3ea   : > { %v2848_v10 = vpop.f32.mrb[23].mxu1 }
 0x3eb   : > { %v1787_v11 = vadd.f32 %v2846_v6, %v4387_v8  ;;  %v2849_v12 = vadd.f32 %v2848_v10, %v2847_v7  ;;  %2982 = vmatprep.mubr.bf16.mxu1 %v1909_v9 }
 0x3ed   : > { %v1790_v23 = vadd.f32 %v2849_v12, %v4387_v8  ;;  %v1883_v13 = vmax.f32 %v1787_v11, 0.0 }
 0x3ef   : > { %v1884_v14 = vmax.f32 %v1790_v23, 0.0  ;;  %v2850_v24 = vpop.f32.mrb[24].mxu1 }
 0x3f0   : > { %v2851_v15 = vpop.f32.mrb[25].mxu1 }
 0x3f1   : > { %v2852_v16 = vadd.f32 %v2851_v15, %v2850_v24  ;;  %v2853_v17 = vpop.f32.mrb[26].mxu1  ;;  %v1910_v18 = vpack.c.bf16 %v1884_v14, %v1883_v13 }
 0x3f2   : > { %v2854_v19 = vpop.f32.mrb[27].mxu1 }
 0x3f3   : > { %v1795_v20 = vadd.f32 %v2852_v16, %v4387_v8  ;;  %v2855_v21 = vadd.f32 %v2854_v19, %v2853_v17  ;;  %2983 = vmatmul.mubr.bf16.gmra.mrb[72].mxu1 %v1910_v18 }
 0x3f5   : > { %v1798_v22 = vadd.f32 %v2855_v21, %v4387_v8  ;;  %v1885_v25 = vmax.f32 %v1795_v20, 0.0 }
 0x3f7   : > { %v1886_v26 = vmax.f32 %v1798_v22, 0.0  ;;  %v2856_v27 = vpop.f32.mrb[28].mxu1 }
 0x3f8   : > { %v2857_v28 = vpop.f32.mrb[29].mxu1 }
 0x3f9   : > { %v2858_v29 = vadd.f32 %v2857_v28, %v2856_v27  ;;  %v2859_v0 = vpop.f32.mrb[30].mxu1  ;;  %v1911_v30 = vpack.c.bf16 %v1886_v26, %v1885_v25 }
 0x3fa   : > { %v2860_v31 = vpop.f32.mrb[31].mxu1 }
 0x3fb   : > { %v1803_v32 = vadd.f32 %v2858_v29, %v4387_v8  ;;  %v2861_v33 = vadd.f32 %v2860_v31, %v2859_v0  ;;  %2986 = vmatprep.mubr.bf16.mxu1 %v1911_v30  ;;  %v3377_v30 = vld [vmem:[#allocation17 + $0x30] sm:$0xff]  }
 0x3fc   : > { %3018 = vmatprep.subr.bf16.mxu1 %v3377_v30 }
 0x3fd   : > { %v1806_v34 = vadd.f32 %v2861_v33, %v4387_v8  ;;  %v1887_v35 = vmax.f32 %v1803_v32, 0.0  ;;  %3019 = vmatpush3.bf16.msra.mxu1 %v3377_v30 }
 0x3ff   : > { %v1888_v36 = vmax.f32 %v1806_v34, 0.0  ;;  %v2862_v37 = vpop.f32.mrb[32].mxu1 }
 0x400   : > { %v2863_v38 = vpop.f32.mrb[33].mxu1 }
 0x401   : > { %v2864_v39 = vadd.f32 %v2863_v38, %v2862_v37  ;;  %v2865_v40 = vpop.f32.mrb[34].mxu1  ;;  %v1912_v41 = vpack.c.bf16 %v1888_v36, %v1887_v35  ;;  %v3378_v38 = vld [vmem:[#allocation17 + $0x38] sm:$0xff]  }
 0x402   : > { %v2866_v42 = vpop.f32.mrb[35].mxu1  ;;  %3020 = vmatprep.subr.bf16.mxu1 %v3378_v38 }
 0x403   : > { %v1811_v43 = vadd.f32 %v2864_v39, %v4387_v8  ;;  %v2867_v44 = vadd.f32 %v2866_v42, %v2865_v40  ;;  %2987 = vmatmul.mubr.bf16.gmra.mrb[76].mxu1 %v1912_v41 }
 0x404   : > { %3021 = vmatpush3.bf16.msra.mxu1 %v3378_v38 }
 0x405   : > { %v1814_v45 = vadd.f32 %v2867_v44, %v4387_v8  ;;  %v1889_v46 = vmax.f32 %v1811_v43, 0.0 }
 0x407   : > { %v1890_v47 = vmax.f32 %v1814_v45, 0.0  ;;  %v2868_v48 = vpop.f32.mrb[36].mxu1 }
 0x408   : > { %v2869_v49 = vpop.f32.mrb[37].mxu1 }
 0x409   : > { %v2870_v50 = vadd.f32 %v2869_v49, %v2868_v48  ;;  %v2871_v51 = vpop.f32.mrb[38].mxu1  ;;  %v1913_v52 = vpack.c.bf16 %v1890_v47, %v1889_v46 }
 0x40a   : > { %v2872_v53 = vpop.f32.mrb[39].mxu1 }
 0x40b   : > { %v1819_v54 = vadd.f32 %v2870_v50, %v4387_v8  ;;  %v2873_v55 = vadd.f32 %v2872_v53, %v2871_v51  ;;  %2990 = vmatprep.mubr.bf16.mxu1 %v1913_v52 }
 0x40d   : > { %v1822_v56 = vadd.f32 %v2873_v55, %v4387_v8  ;;  %v1891_v57 = vmax.f32 %v1819_v54, 0.0 }
 0x40f   : > { %v1892_v58 = vmax.f32 %v1822_v56, 0.0  ;;  %v2874_v59 = vpop.f32.mrb[40].mxu1 }
 0x410   : > { %v2875_v60 = vpop.f32.mrb[41].mxu1 }
 0x411   : > { %v2876_v61 = vadd.f32 %v2875_v60, %v2874_v59  ;;  %v2877_v62 = vpop.f32.mrb[42].mxu1  ;;  %v1914_v63 = vpack.c.bf16 %v1892_v58, %v1891_v57 }
 0x412   : > { %v2878_v1 = vpop.f32.mrb[43].mxu1 }
 0x413   : > { %v1827_v2 = vadd.f32 %v2876_v61, %v4387_v8  ;;  %v2879_v3 = vadd.f32 %v2878_v1, %v2877_v62  ;;  %2991 = vmatmul.mubr.bf16.gmra.mrb[80].mxu1 %v1914_v63 }
 0x415   : > { %v1830_v4 = vadd.f32 %v2879_v3, %v4387_v8  ;;  %v1893_v5 = vmax.f32 %v1827_v2, 0.0  ;;  %v4421_v2 = vld [vmem:[#allocation16] ss:$0 sm:$0xff] }
 0x417   : > { %v1894_v6 = vmax.f32 %v1830_v4, 0.0  ;;  %v2880_v7 = vpop.f32.mrb[44].mxu1 }
 0x418   : > { %v2881_v9 = vpop.f32.mrb[45].mxu1 }
 0x419   : > { %v2882_v10 = vadd.f32 %v2881_v9, %v2880_v7  ;;  %v2883_v11 = vpop.f32.mrb[46].mxu1  ;;  %v1915_v12 = vpack.c.bf16 %v1894_v6, %v1893_v5 }
 0x41a   : > { %v2884_v23 = vpop.f32.mrb[47].mxu1 }
 0x41b   : > { %v1835_v13 = vadd.f32 %v2882_v10, %v4387_v8  ;;  %v2885_v14 = vadd.f32 %v2884_v23, %v2883_v11  ;;  %2994 = vmatprep.mubr.bf16.mxu1 %v1915_v12 }
 0x41d   : > { %v1838_v24 = vadd.f32 %v2885_v14, %v4387_v8  ;;  %v1895_v15 = vmax.f32 %v1835_v13, 0.0 }
 0x41f   : > { %v1896_v16 = vmax.f32 %v1838_v24, 0.0  ;;  %v2886_v17 = vpop.f32.mrb[48].mxu1 }
 0x420   : > { %v2887_v18 = vpop.f32.mrb[49].mxu1 }
 0x421   : > { %v2888_v19 = vadd.f32 %v2887_v18, %v2886_v17  ;;  %v2889_v20 = vpop.f32.mrb[50].mxu1  ;;  %v1916_v21 = vpack.c.bf16 %v1896_v16, %v1895_v15 }
 0x422   : > { %v2890_v22 = vpop.f32.mrb[51].mxu1 }
 0x423   : > { %v1843_v25 = vadd.f32 %v2888_v19, %v4387_v8  ;;  %v2891_v26 = vadd.f32 %v2890_v22, %v2889_v20  ;;  %2995 = vmatmul.mubr.bf16.gmra.mrb[84].mxu1 %v1916_v21 }
 0x425   : > { %v1846_v27 = vadd.f32 %v2891_v26, %v4387_v8  ;;  %v1897_v28 = vmax.f32 %v1843_v25, 0.0 }
 0x427   : > { %v1898_v29 = vmax.f32 %v1846_v27, 0.0  ;;  %v2892_v0 = vpop.f32.mrb[52].mxu1 }
 0x428   : > { %v2893_v31 = vpop.f32.mrb[53].mxu1 }
 0x429   : > { %v2894_v32 = vadd.f32 %v2893_v31, %v2892_v0  ;;  %v2895_v33 = vpop.f32.mrb[54].mxu1  ;;  %v1917_v34 = vpack.c.bf16 %v1898_v29, %v1897_v28 }
 0x42a   : > { %v2896_v35 = vpop.f32.mrb[55].mxu1 }
 0x42b   : > { %v1851_v36 = vadd.f32 %v2894_v32, %v4387_v8  ;;  %v2897_v37 = vadd.f32 %v2896_v35, %v2895_v33  ;;  %2998 = vmatprep.mubr.bf16.mxu1 %v1917_v34 }
 0x42d   : > { %v1854_v39 = vadd.f32 %v2897_v37, %v4387_v8  ;;  %v1899_v40 = vmax.f32 %v1851_v36, 0.0 }
 0x42f   : > { %v1900_v41 = vmax.f32 %v1854_v39, 0.0  ;;  %v2898_v42 = vpop.f32.mrb[56].mxu1 }
 0x430   : > { %v2899_v43 = vpop.f32.mrb[57].mxu1 }
 0x431   : > { %v2900_v44 = vadd.f32 %v2899_v43, %v2898_v42  ;;  %v2901_v45 = vpop.f32.mrb[58].mxu1  ;;  %v1918_v46 = vpack.c.bf16 %v1900_v41, %v1899_v40 }
 0x432   : > { %v2902_v47 = vpop.f32.mrb[59].mxu1 }
 0x433   : > { %v1859_v48 = vadd.f32 %v2900_v44, %v4387_v8  ;;  %v2903_v49 = vadd.f32 %v2902_v47, %v2901_v45  ;;  %2999 = vmatmul.mubr.bf16.gmra.mrb[88].mxu1 %v1918_v46 }
 0x435   : > { %v1862_v50 = vadd.f32 %v2903_v49, %v4387_v8  ;;  %v1901_v51 = vmax.f32 %v1859_v48, 0.0 }
 0x437   : > { %v1902_v52 = vmax.f32 %v1862_v50, 0.0  ;;  %v2904_v53 = vpop.f32.mrb[60].mxu1 }
 0x438   : > { %v2905_v54 = vpop.f32.mrb[61].mxu1 }
 0x439   : > { %v2906_v55 = vadd.f32 %v2905_v54, %v2904_v53  ;;  %v2907_v56 = vpop.f32.mrb[62].mxu1  ;;  %v1919_v57 = vpack.c.bf16 %v1902_v52, %v1901_v51 }
 0x43a   : > { %v2908_v58 = vpop.f32.mrb[63].mxu1 }
 0x43b   : > { %v1867_v59 = vadd.f32 %v2906_v55, %v4387_v8  ;;  %v2909_v60 = vadd.f32 %v2908_v58, %v2907_v56  ;;  %3002 = vmatprep.mubr.bf16.mxu1 %v1919_v57 }
 0x43d   : > { %v1870_v61 = vadd.f32 %v2909_v60, %v4387_v8  ;;  %v1903_v62 = vmax.f32 %v1867_v59, 0.0 }
 0x43f   : > { %v1904_v63 = vmax.f32 %v1870_v61, 0.0 }
 0x441   : > { %v1920_v1 = vpack.c.bf16 %v1904_v63, %v1903_v62 }
 0x443   : > { %3003 = vmatmul.mubr.bf16.gmra.mrb[92].mxu1 %v1920_v1 }
 0x4a6   : > { %v2976_v3 = vpop.f32.mrb[64].mxu1 }
 0x4a7   : > { %v2035_v4 = vadd.f32 %v2976_v3, %v4421_v2  ;;  %v2026_v5 = vpop.f32.mrb[65].mxu1 }
 0x4a8   : > { %v2027_v6 = vadd.f32 %v4421_v2, %v2026_v5  ;;  %v2977_v7 = vpop.f32.mrb[66].mxu1 }
 0x4a9   : > { %v2038_v9 = vadd.f32 %v2977_v7, %v4421_v2  ;;  %v2029_v10 = vpop.f32.mrb[67].mxu1  ;;  %v2155_v12 = vmax.f32 %v2035_v4, 0.0 }
 0x4aa   : > { %v2030_v11 = vadd.f32 %v4421_v2, %v2029_v10  ;;  %v2153_v23 = vmax.f32 %v2027_v6, 0.0 }
 0x4ab   : > { %v2156_v8 = vmax.f32 %v2038_v9, 0.0 }
 0x4ac   : > { %v2154_v13 = vmax.f32 %v2030_v11, 0.0 }
 0x4ad   : > { %v2186_v14 = vpack.c.bf16 %v2156_v8, %v2155_v12 }
 0x4ae   : > { %v2185_v24 = vpack.c.bf16 %v2154_v13, %v2153_v23 }
 0x4b0   : > { %3022 = vmatprep.mubr.bf16.mxu1 %v2185_v24 }
 0x4b1   : > { %3023 = vmatmul.mubr.bf16.vlgmr.msra.gmra.mrb[96].mxu1 %v2186_v14 }
 0x4b6   : > { %v2980_v15 = vpop.f32.mrb[68].mxu1 }
 0x4b7   : > { %v2051_v16 = vadd.f32 %v2980_v15, %v4421_v2  ;;  %v2042_v17 = vpop.f32.mrb[69].mxu1 }
 0x4b8   : > { %v2043_v18 = vadd.f32 %v4421_v2, %v2042_v17  ;;  %v2981_v19 = vpop.f32.mrb[70].mxu1 }
 0x4b9   : > { %v2054_v20 = vadd.f32 %v2981_v19, %v4421_v2  ;;  %v2045_v21 = vpop.f32.mrb[71].mxu1  ;;  %v2159_v25 = vmax.f32 %v2051_v16, 0.0 }
 0x4ba   : > { %v2046_v22 = vadd.f32 %v4421_v2, %v2045_v21  ;;  %v2157_v27 = vmax.f32 %v2043_v18, 0.0 }
 0x4bb   : > { %v2160_v26 = vmax.f32 %v2054_v20, 0.0 }
 0x4bc   : > { %v2158_v28 = vmax.f32 %v2046_v22, 0.0 }
 0x4bd   : > { %v2188_v29 = vpack.c.bf16 %v2160_v26, %v2159_v25 }
 0x4be   : > { %v2187_v0 = vpack.c.bf16 %v2158_v28, %v2157_v27 }
 0x4c0   : > { %3026 = vmatprep.mubr.bf16.mxu1 %v2187_v0 }
 0x4c1   : > { %3027 = vmatmul.mubr.bf16.gmra.mrb[100].mxu1 %v2188_v29 }
 0x4c6   : > { %v2984_v30 = vpop.f32.mrb[72].mxu1 }
 0x4c7   : > { %v2067_v31 = vadd.f32 %v2984_v30, %v4421_v2  ;;  %v2058_v32 = vpop.f32.mrb[73].mxu1 }
 0x4c8   : > { %v2059_v33 = vadd.f32 %v4421_v2, %v2058_v32  ;;  %v2985_v34 = vpop.f32.mrb[74].mxu1 }
 0x4c9   : > { %v2070_v35 = vadd.f32 %v2985_v34, %v4421_v2  ;;  %v2061_v36 = vpop.f32.mrb[75].mxu1  ;;  %v2163_v38 = vmax.f32 %v2067_v31, 0.0 }
 0x4ca   : > { %v2062_v37 = vadd.f32 %v4421_v2, %v2061_v36  ;;  %v2161_v40 = vmax.f32 %v2059_v33, 0.0 }
 0x4cb   : > { %v2164_v39 = vmax.f32 %v2070_v35, 0.0 }
 0x4cc   : > { %v2162_v41 = vmax.f32 %v2062_v37, 0.0 }
 0x4cd   : > { %v2190_v42 = vpack.c.bf16 %v2164_v39, %v2163_v38 }
 0x4ce   : > { %v2189_v43 = vpack.c.bf16 %v2162_v41, %v2161_v40 }
 0x4d0   : > { %3030 = vmatprep.mubr.bf16.mxu1 %v2189_v43 }
 0x4d1   : > { %3031 = vmatmul.mubr.bf16.gmra.mrb[104].mxu1 %v2190_v42 }
 0x4d6   : > { %v2988_v44 = vpop.f32.mrb[76].mxu1 }
 0x4d7   : > { %v2083_v45 = vadd.f32 %v2988_v44, %v4421_v2  ;;  %v2074_v46 = vpop.f32.mrb[77].mxu1 }
 0x4d8   : > { %v2075_v47 = vadd.f32 %v4421_v2, %v2074_v46  ;;  %v2989_v48 = vpop.f32.mrb[78].mxu1 }
 0x4d9   : > { %v2086_v49 = vadd.f32 %v2989_v48, %v4421_v2  ;;  %v2077_v50 = vpop.f32.mrb[79].mxu1  ;;  %v2167_v52 = vmax.f32 %v2083_v45, 0.0 }
 0x4da   : > { %v2078_v51 = vadd.f32 %v4421_v2, %v2077_v50  ;;  %v2165_v54 = vmax.f32 %v2075_v47, 0.0 }
 0x4db   : > { %v2168_v53 = vmax.f32 %v2086_v49, 0.0 }
 0x4dc   : > { %v2166_v55 = vmax.f32 %v2078_v51, 0.0  ;;  %v4456_v51 = vld [vmem:[#allocation19] ss:$0 sm:$0xff] }
 0x4dd   : > { %v2192_v56 = vpack.c.bf16 %v2168_v53, %v2167_v52 }
 0x4de   : > { %v2191_v57 = vpack.c.bf16 %v2166_v55, %v2165_v54 }
 0x4e0   : > { %3034 = vmatprep.mubr.bf16.mxu1 %v2191_v57 }
 0x4e1   : > { %3035 = vmatmul.mubr.bf16.gmra.mrb[108].mxu1 %v2192_v56 }
 0x4e6   : > { %v2992_v58 = vpop.f32.mrb[80].mxu1 }
 0x4e7   : > { %v2099_v59 = vadd.f32 %v2992_v58, %v4421_v2  ;;  %v2090_v60 = vpop.f32.mrb[81].mxu1 }
 0x4e8   : > { %v2091_v61 = vadd.f32 %v4421_v2, %v2090_v60  ;;  %v2993_v62 = vpop.f32.mrb[82].mxu1 }
 0x4e9   : > { %v2102_v63 = vadd.f32 %v2993_v62, %v4421_v2  ;;  %v2093_v1 = vpop.f32.mrb[83].mxu1  ;;  %v2171_v4 = vmax.f32 %v2099_v59, 0.0 }
 0x4ea   : > { %v2094_v3 = vadd.f32 %v4421_v2, %v2093_v1  ;;  %v2169_v6 = vmax.f32 %v2091_v61, 0.0 }
 0x4eb   : > { %v2172_v5 = vmax.f32 %v2102_v63, 0.0 }
 0x4ec   : > { %v2170_v7 = vmax.f32 %v2094_v3, 0.0 }
 0x4ed   : > { %v2194_v9 = vpack.c.bf16 %v2172_v5, %v2171_v4 }
 0x4ee   : > { %v2193_v10 = vpack.c.bf16 %v2170_v7, %v2169_v6 }
 0x4f0   : > { %3038 = vmatprep.mubr.bf16.mxu1 %v2193_v10 }
 0x4f1   : > { %3039 = vmatmul.mubr.bf16.gmra.mrb[112].mxu1 %v2194_v9 }
 0x4f6   : > { %v2996_v11 = vpop.f32.mrb[84].mxu1 }
 0x4f7   : > { %v2115_v12 = vadd.f32 %v2996_v11, %v4421_v2  ;;  %v2106_v8 = vpop.f32.mrb[85].mxu1 }
 0x4f8   : > { %v2107_v23 = vadd.f32 %v4421_v2, %v2106_v8  ;;  %v2997_v13 = vpop.f32.mrb[86].mxu1 }
 0x4f9   : > { %v2118_v14 = vadd.f32 %v2997_v13, %v4421_v2  ;;  %v2109_v24 = vpop.f32.mrb[87].mxu1  ;;  %v2175_v16 = vmax.f32 %v2115_v12, 0.0 }
 0x4fa   : > { %v2110_v15 = vadd.f32 %v4421_v2, %v2109_v24  ;;  %v2173_v18 = vmax.f32 %v2107_v23, 0.0 }
 0x4fb   : > { %v2176_v17 = vmax.f32 %v2118_v14, 0.0 }
 0x4fc   : > { %v2174_v19 = vmax.f32 %v2110_v15, 0.0 }
 0x4fd   : > { %v2196_v20 = vpack.c.bf16 %v2176_v17, %v2175_v16 }
 0x4fe   : > { %v2195_v21 = vpack.c.bf16 %v2174_v19, %v2173_v18 }
 0x500   : > { %3042 = vmatprep.mubr.bf16.mxu1 %v2195_v21 }
 0x501   : > { %3043 = vmatmul.mubr.bf16.gmra.mrb[116].mxu1 %v2196_v20 }
 0x506   : > { %v3000_v22 = vpop.f32.mrb[88].mxu1 }
 0x507   : > { %v2131_v25 = vadd.f32 %v3000_v22, %v4421_v2  ;;  %v2122_v26 = vpop.f32.mrb[89].mxu1 }
 0x508   : > { %v2123_v27 = vadd.f32 %v4421_v2, %v2122_v26  ;;  %v3001_v28 = vpop.f32.mrb[90].mxu1 }
 0x509   : > { %v2134_v29 = vadd.f32 %v3001_v28, %v4421_v2  ;;  %v2125_v0 = vpop.f32.mrb[91].mxu1  ;;  %v2179_v31 = vmax.f32 %v2131_v25, 0.0 }
 0x50a   : > { %v2126_v30 = vadd.f32 %v4421_v2, %v2125_v0  ;;  %v2177_v33 = vmax.f32 %v2123_v27, 0.0 }
 0x50b   : > { %v2180_v32 = vmax.f32 %v2134_v29, 0.0 }
 0x50c   : > { %v2178_v34 = vmax.f32 %v2126_v30, 0.0 }
 0x50d   : > { %v2198_v35 = vpack.c.bf16 %v2180_v32, %v2179_v31 }
 0x50e   : > { %v2197_v36 = vpack.c.bf16 %v2178_v34, %v2177_v33 }
 0x510   : > { %3046 = vmatprep.mubr.bf16.mxu1 %v2197_v36 }
 0x511   : > { %3047 = vmatmul.mubr.bf16.gmra.mrb[120].mxu1 %v2198_v35 }
 0x516   : > { %v3004_v37 = vpop.f32.mrb[92].mxu1 }
 0x517   : > { %v2147_v38 = vadd.f32 %v3004_v37, %v4421_v2  ;;  %v2138_v39 = vpop.f32.mrb[93].mxu1 }
 0x518   : > { %v2139_v40 = vadd.f32 %v4421_v2, %v2138_v39  ;;  %v3005_v41 = vpop.f32.mrb[94].mxu1 }
 0x519   : > { %v2150_v42 = vadd.f32 %v3005_v41, %v4421_v2  ;;  %v2141_v43 = vpop.f32.mrb[95].mxu1  ;;  %v2183_v45 = vmax.f32 %v2147_v38, 0.0 }
 0x51a   : > { %v2142_v44 = vadd.f32 %v4421_v2, %v2141_v43  ;;  %v2181_v47 = vmax.f32 %v2139_v40, 0.0 }
 0x51b   : > { %v2184_v46 = vmax.f32 %v2150_v42, 0.0 }
 0x51c   : > { %v2182_v48 = vmax.f32 %v2142_v44, 0.0 }
 0x51d   : > { %v2200_v49 = vpack.c.bf16 %v2184_v46, %v2183_v45 }
 0x51e   : > { %v2199_v50 = vpack.c.bf16 %v2182_v48, %v2181_v47 }
 0x520   : > { %3050 = vmatprep.mubr.bf16.mxu1 %v2199_v50 }
 0x521   : > { %3051 = vmatmul.mubr.bf16.gmra.mrb[124].mxu1 %v2200_v49 }
 0x584   : > { %v3024_v52 = vpop.f32.mrb[96].mxu1 }
 0x585   : > { %v2315_v53 = vadd.f32 %v3024_v52, %v4456_v51  ;;  %v2306_v54 = vpop.f32.mrb[97].mxu1 }
 0x586   : > { %v2307_v55 = vadd.f32 %v4456_v51, %v2306_v54  ;;  %v3025_v56 = vpop.f32.mrb[98].mxu1 }
 0x587   : > { %2435 = vst [vmem:[%s4460_s7 + $0x10] sm:$0xff] %v2315_v53  ;;  %v2318_v2 = vadd.f32 %v3025_v56, %v4456_v51  ;;  %v2309_v57 = vpop.f32.mrb[99].mxu1 }
 0x588   : > { %2433 = vst [vmem:[%s4460_s7] sm:$0xff] %v2307_v55  ;;  %v2310_v58 = vadd.f32 %v4456_v51, %v2309_v57 }
 0x589   : > { %2436 = vst [vmem:[%s4460_s7 + $0x18] sm:$0xff] %v2318_v2 }
 0x58a   : > { %2434 = vst [vmem:[%s4460_s7 + $0x8] sm:$0xff] %v2310_v58 }
 0x594   : > { %v3028_v59 = vpop.f32.mrb[100].mxu1 }
 0x595   : > { %v2331_v60 = vadd.f32 %v3028_v59, %v4456_v51  ;;  %v2322_v61 = vpop.f32.mrb[101].mxu1 }
 0x596   : > { %v2323_v62 = vadd.f32 %v4456_v51, %v2322_v61  ;;  %v3029_v63 = vpop.f32.mrb[102].mxu1 }
 0x597   : > { %2439 = vst [vmem:[%s4460_s7 + $0x30] sm:$0xff] %v2331_v60  ;;  %v2334_v1 = vadd.f32 %v3029_v63, %v4456_v51  ;;  %v2325_v3 = vpop.f32.mrb[103].mxu1 }
 0x598   : > { %2437 = vst [vmem:[%s4460_s7 + $0x20] sm:$0xff] %v2323_v62  ;;  %v2326_v4 = vadd.f32 %v4456_v51, %v2325_v3 }
 0x599   : > { %2440 = vst [vmem:[%s4460_s7 + $0x38] sm:$0xff] %v2334_v1 }
 0x59a   : > { %2438 = vst [vmem:[%s4460_s7 + $0x28] sm:$0xff] %v2326_v4 }
 0x5a4   : > { %v3032_v5 = vpop.f32.mrb[104].mxu1 }
 0x5a5   : > { %v2347_v6 = vadd.f32 %v3032_v5, %v4456_v51  ;;  %v2338_v7 = vpop.f32.mrb[105].mxu1 }
 0x5a6   : > { %v2339_v9 = vadd.f32 %v4456_v51, %v2338_v7  ;;  %v3033_v10 = vpop.f32.mrb[106].mxu1 }
 0x5a7   : > { %2443 = vst [vmem:[%s4460_s7 + $0x50] sm:$0xff] %v2347_v6  ;;  %v2350_v11 = vadd.f32 %v3033_v10, %v4456_v51  ;;  %v2341_v12 = vpop.f32.mrb[107].mxu1 }
 0x5a8   : > { %2441 = vst [vmem:[%s4460_s7 + $0x40] sm:$0xff] %v2339_v9  ;;  %v2342_v8 = vadd.f32 %v4456_v51, %v2341_v12 }
 0x5a9   : > { %2444 = vst [vmem:[%s4460_s7 + $0x58] sm:$0xff] %v2350_v11 }
 0x5aa   : > { %2442 = vst [vmem:[%s4460_s7 + $0x48] sm:$0xff] %v2342_v8 }
 0x5b4   : > { %v3036_v23 = vpop.f32.mrb[108].mxu1 }
 0x5b5   : > { %v2363_v13 = vadd.f32 %v3036_v23, %v4456_v51  ;;  %v2354_v14 = vpop.f32.mrb[109].mxu1 }
 0x5b6   : > { %v2355_v24 = vadd.f32 %v4456_v51, %v2354_v14  ;;  %v3037_v15 = vpop.f32.mrb[110].mxu1 }
 0x5b7   : > { %2447 = vst [vmem:[%s4460_s7 + $0x70] sm:$0xff] %v2363_v13  ;;  %v2366_v16 = vadd.f32 %v3037_v15, %v4456_v51  ;;  %v2357_v17 = vpop.f32.mrb[111].mxu1 }
 0x5b8   : > { %2445 = vst [vmem:[%s4460_s7 + $0x60] sm:$0xff] %v2355_v24  ;;  %v2358_v18 = vadd.f32 %v4456_v51, %v2357_v17 }
 0x5b9   : > { %2448 = vst [vmem:[%s4460_s7 + $0x78] sm:$0xff] %v2366_v16 }
 0x5ba   : > { %2446 = vst [vmem:[%s4460_s7 + $0x68] sm:$0xff] %v2358_v18 }
 0x5c4   : > { %v3040_v19 = vpop.f32.mrb[112].mxu1 }
 0x5c5   : > { %v2379_v20 = vadd.f32 %v3040_v19, %v4456_v51  ;;  %v2370_v21 = vpop.f32.mrb[113].mxu1 }
 0x5c6   : > { %v2371_v22 = vadd.f32 %v4456_v51, %v2370_v21  ;;  %v3041_v25 = vpop.f32.mrb[114].mxu1 }
 0x5c7   : > { %2451 = vst [vmem:[%s4460_s7 + $0x90] sm:$0xff] %v2379_v20  ;;  %v2382_v26 = vadd.f32 %v3041_v25, %v4456_v51  ;;  %v2373_v27 = vpop.f32.mrb[115].mxu1 }
 0x5c8   : > { %2449 = vst [vmem:[%s4460_s7 + $0x80] sm:$0xff] %v2371_v22  ;;  %v2374_v28 = vadd.f32 %v4456_v51, %v2373_v27 }
 0x5c9   : > { %2452 = vst [vmem:[%s4460_s7 + $0x98] sm:$0xff] %v2382_v26 }
 0x5ca   : > { %2450 = vst [vmem:[%s4460_s7 + $0x88] sm:$0xff] %v2374_v28 }
 0x5d4   : > { %v3044_v29 = vpop.f32.mrb[116].mxu1 }
 0x5d5   : > { %v2395_v0 = vadd.f32 %v3044_v29, %v4456_v51  ;;  %v2386_v30 = vpop.f32.mrb[117].mxu1 }
 0x5d6   : > { %v2387_v31 = vadd.f32 %v4456_v51, %v2386_v30  ;;  %v3045_v32 = vpop.f32.mrb[118].mxu1 }
 0x5d7   : > { %2455 = vst [vmem:[%s4460_s7 + $0xb0] sm:$0xff] %v2395_v0  ;;  %v2398_v33 = vadd.f32 %v3045_v32, %v4456_v51  ;;  %v2389_v34 = vpop.f32.mrb[119].mxu1 }
 0x5d8   : > { %2453 = vst [vmem:[%s4460_s7 + $0xa0] sm:$0xff] %v2387_v31  ;;  %v2390_v35 = vadd.f32 %v4456_v51, %v2389_v34 }
 0x5d9   : > { %2456 = vst [vmem:[%s4460_s7 + $0xb8] sm:$0xff] %v2398_v33 }
 0x5da   : > { %2454 = vst [vmem:[%s4460_s7 + $0xa8] sm:$0xff] %v2390_v35 }
 0x5e4   : > { %v3048_v36 = vpop.f32.mrb[120].mxu1 }
 0x5e5   : > { %v2411_v37 = vadd.f32 %v3048_v36, %v4456_v51  ;;  %v2402_v38 = vpop.f32.mrb[121].mxu1 }
 0x5e6   : > { %v2403_v39 = vadd.f32 %v4456_v51, %v2402_v38  ;;  %v3049_v40 = vpop.f32.mrb[122].mxu1 }
 0x5e7   : > { %2459 = vst [vmem:[%s4460_s7 + $0xd0] sm:$0xff] %v2411_v37  ;;  %v2414_v41 = vadd.f32 %v3049_v40, %v4456_v51  ;;  %v2405_v42 = vpop.f32.mrb[123].mxu1 }
 0x5e8   : > { %2457 = vst [vmem:[%s4460_s7 + $0xc0] sm:$0xff] %v2403_v39  ;;  %v2406_v43 = vadd.f32 %v4456_v51, %v2405_v42 }
 0x5e9   : > { %2460 = vst [vmem:[%s4460_s7 + $0xd8] sm:$0xff] %v2414_v41 }
 0x5ea   : > { %2458 = vst [vmem:[%s4460_s7 + $0xc8] sm:$0xff] %v2406_v43 }
 0x5f4   : > { %v3052_v44 = vpop.f32.mrb[124].mxu1 }
 0x5f5   : > { %v2427_v45 = vadd.f32 %v3052_v44, %v4456_v51  ;;  %v2418_v46 = vpop.f32.mrb[125].mxu1 }
 0x5f6   : > { %v2419_v47 = vadd.f32 %v4456_v51, %v2418_v46  ;;  %v3053_v48 = vpop.f32.mrb[126].mxu1 }
 0x5f7   : > { %2463 = vst [vmem:[%s4460_s7 + $0xf0] sm:$0xff] %v2427_v45  ;;  %v2430_v49 = vadd.f32 %v3053_v48, %v4456_v51  ;;  %v2421_v50 = vpop.f32.mrb[127].mxu1 }
 0x5f8   : > { %2461 = vst [vmem:[%s4460_s7 + $0xe0] sm:$0xff] %v2419_v47  ;;  %v2422_v52 = vadd.f32 %v4456_v51, %v2421_v50 }
 0x5f9   : > { %2464 = vst [vmem:[%s4460_s7 + $0xf8] sm:$0xff] %v2430_v49 }
 0x5fa   : > { %2462 = vst [vmem:[%s4460_s7 + $0xe8] sm:$0xff] %v2422_v52 }
 0x5fb   : > { %3704 = shalt.err (!%p3701_p1)
}
 0x5fc   : > { %s3705_s12 = scalar_lea.hbm %s4525_s15, 4096  ;;  %s3709_s16 = scalar_lea.hbm %s4639_s6, 8192 }
 0x5fd   : > { %p3706_p13 = scmp.ne.s32.totalorder %s4525_s15, %s3705_s12  ;;  %p3710_p2 = scmp.lt.u32.totalorder %s4525_s15, %s4639_s6 }
 0x5fe   : > { %p3711_p6 = scmp.lt.u32.totalorder %s3709_s16, %s3705_s12  ;;  %p3713_p5 = scmp.lt.u32.totalorder %s3705_s12, %s4525_s15 }
 0x5ff   : > { %p3707_p0 = pnand %p3706_p13, %p4640_p9 }
 0x600   : > { %p3712_p10 = por %p3711_p6, %p3710_p2 }
 0x601   : > { %p3708_p7 = pneg %p3707_p0 }
 0x602   : > { %p3714_p4 = por %p3713_p5, %p3712_p10 }
 0x604   : > { %p3715_p8 = pnand %p3714_p4, %p3708_p7 }
 0x606   : > { %3718 = shalt.err (!%p3715_p8)
}
 0x607   : > { %s3800_s1 = smov 128   ;;  %s3801_s7 = smov 8  }
 0x608   : > { %3158 = dma.vmem_to_hbm [thread:$0]  (%p4640_p9), %s4527_s22, 4096, %s4525_s15, %s2466_s23, %s3800_s1, %s3800_s1, %s3801_s7  }
 0x609 PF: > { %s2494_s14 = sand.u32 1, %s3769_s17   ;;  %p4641_p11 = scmp.ne.s32.totalorder %s4621_s13, 0 }
 0x60a   : > { %p4642_p3 = scmp.ge.s32.totalorder %s3781_s20, 2  ;;  %s2495_s4 = scalar_lea.sflag [#allocation4], %s2494_s14 }
 0x60c   : > { %p3196_p12 = pnand %p4642_p3, %p4641_p11 }
 0x60e   : > { %3764 = dma.done.wait (!%p3196_p12), %s2495_s4, 4096  }
 0x60f   : > { %3766 = vsyncadd (!%p3196_p12), %s2495_s4, 4294963200  ;;  %p31_p1 = scmp.ge.s32.totalorder %s4101_s27, 4   ;;  %s4643_s17 = smov %s3773_s18 }
 0x610   : > { %s4644_s18 = smov %s3777_s19  ;;  %s4645_s19 = smov %s4113_s29 }
 0x611   : > { %s4646_s20 = smov %s4101_s27  ;;  %33 = sbr.rel (!%p31_p1) target bundleno = 22 (0x16), region = 158 }
 0x618   :  { %2500 = vsyncpa [#allocation3], 1 }
 0x619   :  { %2502 = vsyncpa [#allocation3 + $0x1], 1 }
 0x61a   :  { %2503 = vsyncpa [#allocation6], 1 }
 0x61b   :  { %2505 = vsyncpa [#allocation6 + $0x1], 1 }
 0x61c   :  { %2506 = vsyncpa [#allocation9], 1 }
 0x61d   :  { %2507 = vsyncpa [#allocation12], 1 }
 0x61e   :  { %2508 = vsyncpa [#allocation15], 1 }
 0x61f   :  { %2509 = vsyncpa [#allocation18], 1 }
 0x620   :  { %2510 = vsyncpa [#allocation4], 1 }
 0x621   :  { %2512 = vsyncpa [#allocation4 + $0x1], 1 }

</bundles_post_ra>
